<compile_context>
chip_gen: v6e
topology: v6e:2x2x1
jax: 0.10.0
libtpu: 0.0.40
codegen_flags: <defaults>
</compile_context>

<pallas_src>
import functools

import jax
import jax.numpy as jnp
from jax.experimental import pallas as pl
from jax.experimental.pallas import tpu as pltpu


def _lstm_classifier_kernel(H, T, B,
                            x_ref,                      # (T*B, F) time-major, flattened
                            wih1_ref, whh1_ref, b1_ref,  # (F,4H), (H,4H), (1,4H)
                            wih2_ref, whh2_ref, b2_ref,  # (H,4H), (H,4H), (1,4H)
                            wout_ref, bout_ref,          # (H,OUT_PAD), (1,OUT_PAD)
                            out_ref,                     # (B, OUT_PAD)
                            xh1_s, xh2_s, h1_s):         # VMEM scratch
    """Whole forward pass (both LSTM layers + regressor), VMEM-resident."""

    # ---- Layer 1: batched input-to-hidden projection (one matmul, bias folded in).
    xh1_s[...] = (jnp.dot(x_ref[...], wih1_ref[...],
                          preferred_element_type=jnp.float32)
                  + b1_ref[...])                              # (T*B, 4H)

    # Hoist loop-invariant weight loads out of the recurrences.
    whh1 = whh1_ref[...]
    whh2 = whh2_ref[...]

    def cell(pre, h_prev, c_prev, whh):
        # pre = x_t @ W_ih + b (precomputed); only h_prev @ W_hh is serial.
        gates = pre + jnp.dot(h_prev, whh, preferred_element_type=jnp.float32)
        # PyTorch gate order: [i, f, g, o]
        i = jax.nn.sigmoid(gates[:, 0:H])
        f = jax.nn.sigmoid(gates[:, H:2 * H])
        g = jnp.tanh(gates[:, 2 * H:3 * H])
        o = jax.nn.sigmoid(gates[:, 3 * H:4 * H])
        c_new = f * c_prev + i * g
        h_new = o * jnp.tanh(c_new)
        return h_new, c_new

    zeros = jnp.zeros((B, H), jnp.float32)

    # ---- Layer-1 recurrence: fully unrolled, h/c carried in vregs,
    #      h sequence spilled to VMEM scratch for the layer-2 batched projection.
    h1, c1 = zeros, zeros
    for t in range(T):
        h1, c1 = cell(xh1_s[pl.ds(t * B, B), :], h1, c1, whh1)
        h1_s[pl.ds(t * B, B), :] = h1

    # ---- Layer 2: batched input-to-hidden projection on the whole h1 sequence.
    xh2_s[...] = (jnp.dot(h1_s[...], wih2_ref[...],
                          preferred_element_type=jnp.float32)
                  + b2_ref[...])                              # (T*B, 4H)

    # ---- Layer-2 recurrence: fully unrolled, states in vregs.
    h2, c2 = zeros, zeros
    for t in range(T):
        h2, c2 = cell(xh2_s[pl.ds(t * B, B), :], h2, c2, whh2)

    # ---- Regressor: BatchNorm1d (eval) is pre-folded into wout/bout;
    #      Dropout(0.7) is identity in eval mode.  Output is lane-dense (padded).
    out_ref[...] = (jnp.dot(h2, wout_ref[...],
                            preferred_element_type=jnp.float32)
                    + bout_ref[...])


def state_classifier_mimic_forward(x_bft, params):
    """x_bft: (B, feature_size, T), like the PyTorch module's input."""
    B, F, T = x_bft.shape
    # input.permute(2, 0, 1) -> time-major, then flatten time*batch (layout only).
    x2d = jnp.transpose(x_bft, (2, 0, 1)).astype(jnp.float32).reshape(T * B, F)

    H = params["whh1"].shape[0]
    n_state = params["n_state"]
    out_pad = params["wout"].shape[1]

    kernel = functools.partial(_lstm_classifier_kernel, H, T, B)
    vmem = pl.BlockSpec(memory_space=pltpu.MemorySpace.VMEM)

    out = pl.pallas_call(
        kernel,
        out_shape=jax.ShapeDtypeStruct((B, out_pad), jnp.float32),
        in_specs=[vmem] * 9,
        out_specs=vmem,
        scratch_shapes=[
            pltpu.VMEM((T * B, 4 * H), jnp.float32),   # layer-1 x-projection
            pltpu.VMEM((T * B, 4 * H), jnp.float32),   # layer-2 x-projection
            pltpu.VMEM((T * B, H), jnp.float32),       # layer-1 hidden sequence
        ],
    )(x2d,
      params["wih1"], params["whh1"], params["b1"],
      params["wih2"], params["whh2"], params["b2"],
      params["wout"], params["bout"])
    # Slice the lane-padded output back to n_state.
    return out[:, :n_state]


def init_params(key, feature_size, hidden_size, n_state, out_pad=128):
    """Deterministic synthetic parameters mirroring nn.LSTM / nn.Linear shapes."""
    H = hidden_size
    k = 1.0 / jnp.sqrt(jnp.float32(H))
    keys = jax.random.split(key, 10)

    def u(k_, shape):
        return jax.random.uniform(k_, shape, jnp.float32, -k, k)

    # nn.LSTM layer 1: weight_ih (4H, F), weight_hh (4H, H), biases (4H,)
    w_ih1 = u(keys[0], (4 * H, feature_size))
    w_hh1 = u(keys[1], (4 * H, H))
    b_ih1 = u(keys[2], (4 * H,))
    b_hh1 = u(keys[3], (4 * H,))
    # nn.LSTM layer 2: weight_ih (4H, H)
    w_ih2 = u(keys[4], (4 * H, H))
    w_hh2 = u(keys[5], (4 * H, H))
    b_ih2 = u(keys[6], (4 * H,))
    b_hh2 = u(keys[7], (4 * H,))
    # nn.Linear(H, n_state)
    w_out = u(keys[8], (n_state, H))
    b_out = u(keys[9], (n_state,))

    # nn.BatchNorm1d(H) eval with default running stats (mean=0, var=1,
    # gamma=1, beta=0, eps=1e-5), folded into the output linear.
    eps = 1e-5
    gamma = jnp.ones((H,), jnp.float32)
    beta = jnp.zeros((H,), jnp.float32)
    running_mean = jnp.zeros((H,), jnp.float32)
    running_var = jnp.ones((H,), jnp.float32)
    bn_scale = gamma / jnp.sqrt(running_var + eps)          # (H,)
    bn_bias = beta - running_mean * bn_scale                # (H,)

    wout = w_out.T                                          # (H, n_state)
    wout_folded = wout * bn_scale[:, None]                  # (H, n_state)
    bout_folded = b_out + bn_bias @ wout                    # (n_state,)

    # Lane-dense output: zero-pad the output dimension up to `out_pad` lanes.
    wout_pad = jnp.zeros((H, out_pad), jnp.float32).at[:, :n_state].set(wout_folded)
    bout_pad = jnp.zeros((out_pad,), jnp.float32).at[:n_state].set(bout_folded)

    return {
        # kernel expects right-multiplication: x @ W  (W transposed vs PyTorch)
        "wih1": w_ih1.T,                      # (F, 4H)
        "whh1": w_hh1.T,                      # (H, 4H)
        "b1": (b_ih1 + b_hh1)[None, :],       # (1, 4H)
        "wih2": w_ih2.T,                      # (H, 4H)
        "whh2": w_hh2.T,                      # (H, 4H)
        "b2": (b_ih2 + b_hh2)[None, :],       # (1, 4H)
        "wout": wout_pad,                     # (H, out_pad), BN folded, zero-padded
        "bout": bout_pad[None, :],            # (1, out_pad)
        "n_state": n_state,                   # Python int, used by wrapper slice
    }


if __name__ == "__main__":
    # Small shapes consistent with the module: batch=2, feature_size=4,
    # seq_len=8, hidden_size=32, n_state=4.
    B, FEAT, T, H, N_STATE = 2, 4, 8, 32, 4

    key = jax.random.PRNGKey(0)
    kx, kp = jax.random.split(key)
    x = jax.random.normal(kx, (B, FEAT, T), jnp.float32)   # PyTorch-style (B, feature, T)
    params = init_params(kp, FEAT, H, N_STATE)

    out = state_classifier_mimic_forward(x, params)
    out = jax.block_until_ready(out)
    assert out.shape == (B, N_STATE)
    assert jnp.all(jnp.isfinite(out))
    print("KERNEL_OK")
</pallas_src>

<mosaic_0001>
module attributes {stable_mosaic.version = 11 : i64} {
  func.func @_lstm_classifier_kernel(%arg0: memref<16x4xf32, #tpu.memory_space<vmem>>, %arg1: memref<4x128xf32, #tpu.memory_space<vmem>>, %arg2: memref<32x128xf32, #tpu.memory_space<vmem>>, %arg3: memref<1x128xf32, #tpu.memory_space<vmem>>, %arg4: memref<32x128xf32, #tpu.memory_space<vmem>>, %arg5: memref<32x128xf32, #tpu.memory_space<vmem>>, %arg6: memref<1x128xf32, #tpu.memory_space<vmem>>, %arg7: memref<32x128xf32, #tpu.memory_space<vmem>>, %arg8: memref<1x128xf32, #tpu.memory_space<vmem>>, %arg9: memref<2x128xf32, #tpu.memory_space<vmem>>, %arg10: memref<16x128xf32, #tpu.memory_space<vmem>>, %arg11: memref<16x128xf32, #tpu.memory_space<vmem>>, %arg12: memref<16x32xf32, #tpu.memory_space<vmem>>) attributes {dimension_semantics = [], scalar_prefetch = 0 : i64, scratch_operands = 3 : i64, tpu.core_type = #tpu.core_type<tc>} {
    %c0 = arith.constant 0 : index
    %c0_0 = arith.constant 0 : index
    %0 = vector.load %arg0[%c0, %c0_0] : memref<16x4xf32, #tpu.memory_space<vmem>>, vector<16x4xf32>
    %c0_1 = arith.constant 0 : index
    %c0_2 = arith.constant 0 : index
    %1 = vector.load %arg1[%c0_1, %c0_2] : memref<4x128xf32, #tpu.memory_space<vmem>>, vector<4x128xf32>
    %cst = arith.constant dense<0.000000e+00> : vector<16x128xf32>
    %2 = tpu.matmul %0, %1, %cst {dimension_numbers = #tpu.dot_dimension_numbers<[1], [0], [0], [1], [0, 0, 1, 1], [], []>} : vector<16x4xf32>, vector<4x128xf32>, vector<16x128xf32> -> vector<16x128xf32>
    %c0_3 = arith.constant 0 : index
    %c0_4 = arith.constant 0 : index
    %3 = vector.load %arg3[%c0_3, %c0_4] : memref<1x128xf32, #tpu.memory_space<vmem>>, vector<1x128xf32>
    %4 = vector.broadcast %3 : vector<1x128xf32> to vector<16x128xf32>
    %5 = arith.addf %2, %4 : vector<16x128xf32>
    %c0_5 = arith.constant 0 : index
    %c0_6 = arith.constant 0 : index
    %6 = vector.load %arg10[%c0_5, %c0_6] : memref<16x128xf32, #tpu.memory_space<vmem>>, vector<16x128xf32>
    tpu.vector_store %arg10[%c0_5, %c0_6], %5 {strides = array<i32>} : memref<16x128xf32, #tpu.memory_space<vmem>>, vector<16x128xf32>,
    %c0_7 = arith.constant 0 : index
    %c0_8 = arith.constant 0 : index
    %7 = vector.load %arg2[%c0_7, %c0_8] : memref<32x128xf32, #tpu.memory_space<vmem>>, vector<32x128xf32>
    %c0_9 = arith.constant 0 : index
    %c0_10 = arith.constant 0 : index
    %8 = vector.load %arg5[%c0_9, %c0_10] : memref<32x128xf32, #tpu.memory_space<vmem>>, vector<32x128xf32>
    %cst_11 = arith.constant 0.000000e+00 : f32
    %9 = vector.broadcast %cst_11 : f32 to vector<2x32xf32>
    %c0_12 = arith.constant 0 : index
    %c0_13 = arith.constant 0 : index
    %10 = vector.load %arg10[%c0_12, %c0_13] : memref<16x128xf32, #tpu.memory_space<vmem>>, vector<2x128xf32>
    %cst_14 = arith.constant dense<0.000000e+00> : vector<2x128xf32>
    %11 = tpu.matmul %9, %7, %cst_14 {dimension_numbers = #tpu.dot_dimension_numbers<[1], [0], [0], [1], [0, 0, 1, 1], [], []>} : vector<2x32xf32>, vector<32x128xf32>, vector<2x128xf32> -> vector<2x128xf32>
    %12 = arith.addf %10, %11 : vector<2x128xf32>
    %13 = vector.extract_strided_slice %12 {offsets = [0, 0], sizes = [2, 32], strides = [1, 1]} : vector<2x128xf32> to vector<2x32xf32>
    %14 = arith.negf %13 : vector<2x32xf32>
    %15 = math.exp %14 : vector<2x32xf32>
    %cst_15 = arith.constant 1.000000e+00 : f32
    %16 = vector.broadcast %cst_15 : f32 to vector<2x32xf32>
    %17 = arith.addf %16, %15 : vector<2x32xf32>
    %18 = arith.divf %16, %17 : vector<2x32xf32>
    %19 = vector.extract_strided_slice %12 {offsets = [0, 32], sizes = [2, 32], strides = [1, 1]} : vector<2x128xf32> to vector<2x32xf32>
    %20 = arith.negf %19 : vector<2x32xf32>
    %21 = math.exp %20 : vector<2x32xf32>
    %cst_16 = arith.constant 1.000000e+00 : f32
    %22 = vector.broadcast %cst_16 : f32 to vector<2x32xf32>
    %23 = arith.addf %22, %21 : vector<2x32xf32>
    %24 = arith.divf %22, %23 : vector<2x32xf32>
    %25 = vector.extract_strided_slice %12 {offsets = [0, 64], sizes = [2, 32], strides = [1, 1]} : vector<2x128xf32> to vector<2x32xf32>
    %26 = math.tanh %25 : vector<2x32xf32>
    %27 = vector.extract_strided_slice %12 {offsets = [0, 96], sizes = [2, 32], strides = [1, 1]} : vector<2x128xf32> to vector<2x32xf32>
    %28 = arith.negf %27 : vector<2x32xf32>
    %29 = math.exp %28 : vector<2x32xf32>
    %cst_17 = arith.constant 1.000000e+00 : f32
    %30 = vector.broadcast %cst_17 : f32 to vector<2x32xf32>
    %31 = arith.addf %30, %29 : vector<2x32xf32>
    %32 = arith.divf %30, %31 : vector<2x32xf32>
    %33 = arith.mulf %24, %9 : vector<2x32xf32>
    %34 = arith.mulf %18, %26 : vector<2x32xf32>
    %35 = arith.addf %33, %34 : vector<2x32xf32>
    %36 = math.tanh %35 : vector<2x32xf32>
    %37 = arith.mulf %32, %36 : vector<2x32xf32>
    %c0_18 = arith.constant 0 : index
    %c0_19 = arith.constant 0 : index
    %38 = vector.load %arg12[%c0_18, %c0_19] : memref<16x32xf32, #tpu.memory_space<vmem>>, vector<2x32xf32>
    tpu.vector_store %arg12[%c0_18, %c0_19], %37 {strides = array<i32>} : memref<16x32xf32, #tpu.memory_space<vmem>>, vector<2x32xf32>,
    %c2 = arith.constant 2 : index
    %c0_20 = arith.constant 0 : index
    %39 = vector.load %arg10[%c2, %c0_20] : memref<16x128xf32, #tpu.memory_space<vmem>>, vector<2x128xf32>
    %cst_21 = arith.constant dense<0.000000e+00> : vector<2x128xf32>
    %40 = tpu.matmul %37, %7, %cst_21 {dimension_numbers = #tpu.dot_dimension_numbers<[1], [0], [0], [1], [0, 0, 1, 1], [], []>} : vector<2x32xf32>, vector<32x128xf32>, vector<2x128xf32> -> vector<2x128xf32>
    %41 = arith.addf %39, %40 : vector<2x128xf32>
    %42 = vector.extract_strided_slice %41 {offsets = [0, 0], sizes = [2, 32], strides = [1, 1]} : vector<2x128xf32> to vector<2x32xf32>
    %43 = arith.negf %42 : vector<2x32xf32>
    %44 = math.exp %43 : vector<2x32xf32>
    %cst_22 = arith.constant 1.000000e+00 : f32
    %45 = vector.broadcast %cst_22 : f32 to vector<2x32xf32>
    %46 = arith.addf %45, %44 : vector<2x32xf32>
    %47 = arith.divf %45, %46 : vector<2x32xf32>
    %48 = vector.extract_strided_slice %41 {offsets = [0, 32], sizes = [2, 32], strides = [1, 1]} : vector<2x128xf32> to vector<2x32xf32>
    %49 = arith.negf %48 : vector<2x32xf32>
    %50 = math.exp %49 : vector<2x32xf32>
    %cst_23 = arith.constant 1.000000e+00 : f32
    %51 = vector.broadcast %cst_23 : f32 to vector<2x32xf32>
    %52 = arith.addf %51, %50 : vector<2x32xf32>
    %53 = arith.divf %51, %52 : vector<2x32xf32>
    %54 = vector.extract_strided_slice %41 {offsets = [0, 64], sizes = [2, 32], strides = [1, 1]} : vector<2x128xf32> to vector<2x32xf32>
    %55 = math.tanh %54 : vector<2x32xf32>
    %56 = vector.extract_strided_slice %41 {offsets = [0, 96], sizes = [2, 32], strides = [1, 1]} : vector<2x128xf32> to vector<2x32xf32>
    %57 = arith.negf %56 : vector<2x32xf32>
    %58 = math.exp %57 : vector<2x32xf32>
    %cst_24 = arith.constant 1.000000e+00 : f32
    %59 = vector.broadcast %cst_24 : f32 to vector<2x32xf32>
    %60 = arith.addf %59, %58 : vector<2x32xf32>
    %61 = arith.divf %59, %60 : vector<2x32xf32>
    %62 = arith.mulf %53, %35 : vector<2x32xf32>
    %63 = arith.mulf %47, %55 : vector<2x32xf32>
    %64 = arith.addf %62, %63 : vector<2x32xf32>
    %65 = math.tanh %64 : vector<2x32xf32>
    %66 = arith.mulf %61, %65 : vector<2x32xf32>
    %c2_25 = arith.constant 2 : index
    %c0_26 = arith.constant 0 : index
    %67 = vector.load %arg12[%c2_25, %c0_26] : memref<16x32xf32, #tpu.memory_space<vmem>>, vector<2x32xf32>
    tpu.vector_store %arg12[%c2_25, %c0_26], %66 {strides = array<i32>} : memref<16x32xf32, #tpu.memory_space<vmem>>, vector<2x32xf32>,
    %c4 = arith.constant 4 : index
    %c0_27 = arith.constant 0 : index
    %68 = vector.load %arg10[%c4, %c0_27] : memref<16x128xf32, #tpu.memory_space<vmem>>, vector<2x128xf32>
    %cst_28 = arith.constant dense<0.000000e+00> : vector<2x128xf32>
    %69 = tpu.matmul %66, %7, %cst_28 {dimension_numbers = #tpu.dot_dimension_numbers<[1], [0], [0], [1], [0, 0, 1, 1], [], []>} : vector<2x32xf32>, vector<32x128xf32>, vector<2x128xf32> -> vector<2x128xf32>
    %70 = arith.addf %68, %69 : vector<2x128xf32>
    %71 = vector.extract_strided_slice %70 {offsets = [0, 0], sizes = [2, 32], strides = [1, 1]} : vector<2x128xf32> to vector<2x32xf32>
    %72 = arith.negf %71 : vector<2x32xf32>
    %73 = math.exp %72 : vector<2x32xf32>
    %cst_29 = arith.constant 1.000000e+00 : f32
    %74 = vector.broadcast %cst_29 : f32 to vector<2x32xf32>
    %75 = arith.addf %74, %73 : vector<2x32xf32>
    %76 = arith.divf %74, %75 : vector<2x32xf32>
    %77 = vector.extract_strided_slice %70 {offsets = [0, 32], sizes = [2, 32], strides = [1, 1]} : vector<2x128xf32> to vector<2x32xf32>
    %78 = arith.negf %77 : vector<2x32xf32>
    %79 = math.exp %78 : vector<2x32xf32>
    %cst_30 = arith.constant 1.000000e+00 : f32
    %80 = vector.broadcast %cst_30 : f32 to vector<2x32xf32>
    %81 = arith.addf %80, %79 : vector<2x32xf32>
    %82 = arith.divf %80, %81 : vector<2x32xf32>
    %83 = vector.extract_strided_slice %70 {offsets = [0, 64], sizes = [2, 32], strides = [1, 1]} : vector<2x128xf32> to vector<2x32xf32>
    %84 = math.tanh %83 : vector<2x32xf32>
    %85 = vector.extract_strided_slice %70 {offsets = [0, 96], sizes = [2, 32], strides = [1, 1]} : vector<2x128xf32> to vector<2x32xf32>
    %86 = arith.negf %85 : vector<2x32xf32>
    %87 = math.exp %86 : vector<2x32xf32>
    %cst_31 = arith.constant 1.000000e+00 : f32
    %88 = vector.broadcast %cst_31 : f32 to vector<2x32xf32>
    %89 = arith.addf %88, %87 : vector<2x32xf32>
    %90 = arith.divf %88, %89 : vector<2x32xf32>
    %91 = arith.mulf %82, %64 : vector<2x32xf32>
    %92 = arith.mulf %76, %84 : vector<2x32xf32>
    %93 = arith.addf %91, %92 : vector<2x32xf32>
    %94 = math.tanh %93 : vector<2x32xf32>
    %95 = arith.mulf %90, %94 : vector<2x32xf32>
    %c4_32 = arith.constant 4 : index
    %c0_33 = arith.constant 0 : index
    %96 = vector.load %arg12[%c4_32, %c0_33] : memref<16x32xf32, #tpu.memory_space<vmem>>, vector<2x32xf32>
    tpu.vector_store %arg12[%c4_32, %c0_33], %95 {strides = array<i32>} : memref<16x32xf32, #tpu.memory_space<vmem>>, vector<2x32xf32>,
    %c6 = arith.constant 6 : index
    %c0_34 = arith.constant 0 : index
    %97 = vector.load %arg10[%c6, %c0_34] : memref<16x128xf32, #tpu.memory_space<vmem>>, vector<2x128xf32>
    %cst_35 = arith.constant dense<0.000000e+00> : vector<2x128xf32>
    %98 = tpu.matmul %95, %7, %cst_35 {dimension_numbers = #tpu.dot_dimension_numbers<[1], [0], [0], [1], [0, 0, 1, 1], [], []>} : vector<2x32xf32>, vector<32x128xf32>, vector<2x128xf32> -> vector<2x128xf32>
    %99 = arith.addf %97, %98 : vector<2x128xf32>
    %100 = vector.extract_strided_slice %99 {offsets = [0, 0], sizes = [2, 32], strides = [1, 1]} : vector<2x128xf32> to vector<2x32xf32>
    %101 = arith.negf %100 : vector<2x32xf32>
    %102 = math.exp %101 : vector<2x32xf32>
    %cst_36 = arith.constant 1.000000e+00 : f32
    %103 = vector.broadcast %cst_36 : f32 to vector<2x32xf32>
    %104 = arith.addf %103, %102 : vector<2x32xf32>
    %105 = arith.divf %103, %104 : vector<2x32xf32>
    %106 = vector.extract_strided_slice %99 {offsets = [0, 32], sizes = [2, 32], strides = [1, 1]} : vector<2x128xf32> to vector<2x32xf32>
    %107 = arith.negf %106 : vector<2x32xf32>
    %108 = math.exp %107 : vector<2x32xf32>
    %cst_37 = arith.constant 1.000000e+00 : f32
    %109 = vector.broadcast %cst_37 : f32 to vector<2x32xf32>
    %110 = arith.addf %109, %108 : vector<2x32xf32>
    %111 = arith.divf %109, %110 : vector<2x32xf32>
    %112 = vector.extract_strided_slice %99 {offsets = [0, 64], sizes = [2, 32], strides = [1, 1]} : vector<2x128xf32> to vector<2x32xf32>
    %113 = math.tanh %112 : vector<2x32xf32>
    %114 = vector.extract_strided_slice %99 {offsets = [0, 96], sizes = [2, 32], strides = [1, 1]} : vector<2x128xf32> to vector<2x32xf32>
    %115 = arith.negf %114 : vector<2x32xf32>
    %116 = math.exp %115 : vector<2x32xf32>
    %cst_38 = arith.constant 1.000000e+00 : f32
    %117 = vector.broadcast %cst_38 : f32 to vector<2x32xf32>
    %118 = arith.addf %117, %116 : vector<2x32xf32>
    %119 = arith.divf %117, %118 : vector<2x32xf32>
    %120 = arith.mulf %111, %93 : vector<2x32xf32>
    %121 = arith.mulf %105, %113 : vector<2x32xf32>
    %122 = arith.addf %120, %121 : vector<2x32xf32>
    %123 = math.tanh %122 : vector<2x32xf32>
    %124 = arith.mulf %119, %123 : vector<2x32xf32>
    %c6_39 = arith.constant 6 : index
    %c0_40 = arith.constant 0 : index
    %125 = vector.load %arg12[%c6_39, %c0_40] : memref<16x32xf32, #tpu.memory_space<vmem>>, vector<2x32xf32>
    tpu.vector_store %arg12[%c6_39, %c0_40], %124 {strides = array<i32>} : memref<16x32xf32, #tpu.memory_space<vmem>>, vector<2x32xf32>,
    %c8 = arith.constant 8 : index
    %c0_41 = arith.constant 0 : index
    %126 = vector.load %arg10[%c8, %c0_41] : memref<16x128xf32, #tpu.memory_space<vmem>>, vector<2x128xf32>
    %cst_42 = arith.constant dense<0.000000e+00> : vector<2x128xf32>
    %127 = tpu.matmul %124, %7, %cst_42 {dimension_numbers = #tpu.dot_dimension_numbers<[1], [0], [0], [1], [0, 0, 1, 1], [], []>} : vector<2x32xf32>, vector<32x128xf32>, vector<2x128xf32> -> vector<2x128xf32>
    %128 = arith.addf %126, %127 : vector<2x128xf32>
    %129 = vector.extract_strided_slice %128 {offsets = [0, 0], sizes = [2, 32], strides = [1, 1]} : vector<2x128xf32> to vector<2x32xf32>
    %130 = arith.negf %129 : vector<2x32xf32>
    %131 = math.exp %130 : vector<2x32xf32>
    %cst_43 = arith.constant 1.000000e+00 : f32
    %132 = vector.broadcast %cst_43 : f32 to vector<2x32xf32>
    %133 = arith.addf %132, %131 : vector<2x32xf32>
    %134 = arith.divf %132, %133 : vector<2x32xf32>
    %135 = vector.extract_strided_slice %128 {offsets = [0, 32], sizes = [2, 32], strides = [1, 1]} : vector<2x128xf32> to vector<2x32xf32>
    %136 = arith.negf %135 : vector<2x32xf32>
    %137 = math.exp %136 : vector<2x32xf32>
    %cst_44 = arith.constant 1.000000e+00 : f32
    %138 = vector.broadcast %cst_44 : f32 to vector<2x32xf32>
    %139 = arith.addf %138, %137 : vector<2x32xf32>
    %140 = arith.divf %138, %139 : vector<2x32xf32>
    %141 = vector.extract_strided_slice %128 {offsets = [0, 64], sizes = [2, 32], strides = [1, 1]} : vector<2x128xf32> to vector<2x32xf32>
    %142 = math.tanh %141 : vector<2x32xf32>
    %143 = vector.extract_strided_slice %128 {offsets = [0, 96], sizes = [2, 32], strides = [1, 1]} : vector<2x128xf32> to vector<2x32xf32>
    %144 = arith.negf %143 : vector<2x32xf32>
    %145 = math.exp %144 : vector<2x32xf32>
    %cst_45 = arith.constant 1.000000e+00 : f32
    %146 = vector.broadcast %cst_45 : f32 to vector<2x32xf32>
    %147 = arith.addf %146, %145 : vector<2x32xf32>
    %148 = arith.divf %146, %147 : vector<2x32xf32>
    %149 = arith.mulf %140, %122 : vector<2x32xf32>
    %150 = arith.mulf %134, %142 : vector<2x32xf32>
    %151 = arith.addf %149, %150 : vector<2x32xf32>
    %152 = math.tanh %151 : vector<2x32xf32>
    %153 = arith.mulf %148, %152 : vector<2x32xf32>
    %c8_46 = arith.constant 8 : index
    %c0_47 = arith.constant 0 : index
    %154 = vector.load %arg12[%c8_46, %c0_47] : memref<16x32xf32, #tpu.memory_space<vmem>>, vector<2x32xf32>
    tpu.vector_store %arg12[%c8_46, %c0_47], %153 {strides = array<i32>} : memref<16x32xf32, #tpu.memory_space<vmem>>, vector<2x32xf32>,
    %c10 = arith.constant 10 : index
    %c0_48 = arith.constant 0 : index
    %155 = vector.load %arg10[%c10, %c0_48] : memref<16x128xf32, #tpu.memory_space<vmem>>, vector<2x128xf32>
    %cst_49 = arith.constant dense<0.000000e+00> : vector<2x128xf32>
    %156 = tpu.matmul %153, %7, %cst_49 {dimension_numbers = #tpu.dot_dimension_numbers<[1], [0], [0], [1], [0, 0, 1, 1], [], []>} : vector<2x32xf32>, vector<32x128xf32>, vector<2x128xf32> -> vector<2x128xf32>
    %157 = arith.addf %155, %156 : vector<2x128xf32>
    %158 = vector.extract_strided_slice %157 {offsets = [0, 0], sizes = [2, 32], strides = [1, 1]} : vector<2x128xf32> to vector<2x32xf32>
    %159 = arith.negf %158 : vector<2x32xf32>
    %160 = math.exp %159 : vector<2x32xf32>
    %cst_50 = arith.constant 1.000000e+00 : f32
    %161 = vector.broadcast %cst_50 : f32 to vector<2x32xf32>
    %162 = arith.addf %161, %160 : vector<2x32xf32>
    %163 = arith.divf %161, %162 : vector<2x32xf32>
    %164 = vector.extract_strided_slice %157 {offsets = [0, 32], sizes = [2, 32], strides = [1, 1]} : vector<2x128xf32> to vector<2x32xf32>
    %165 = arith.negf %164 : vector<2x32xf32>
    %166 = math.exp %165 : vector<2x32xf32>
    %cst_51 = arith.constant 1.000000e+00 : f32
    %167 = vector.broadcast %cst_51 : f32 to vector<2x32xf32>
    %168 = arith.addf %167, %166 : vector<2x32xf32>
    %169 = arith.divf %167, %168 : vector<2x32xf32>
    %170 = vector.extract_strided_slice %157 {offsets = [0, 64], sizes = [2, 32], strides = [1, 1]} : vector<2x128xf32> to vector<2x32xf32>
    %171 = math.tanh %170 : vector<2x32xf32>
    %172 = vector.extract_strided_slice %157 {offsets = [0, 96], sizes = [2, 32], strides = [1, 1]} : vector<2x128xf32> to vector<2x32xf32>
    %173 = arith.negf %172 : vector<2x32xf32>
    %174 = math.exp %173 : vector<2x32xf32>
    %cst_52 = arith.constant 1.000000e+00 : f32
    %175 = vector.broadcast %cst_52 : f32 to vector<2x32xf32>
    %176 = arith.addf %175, %174 : vector<2x32xf32>
    %177 = arith.divf %175, %176 : vector<2x32xf32>
    %178 = arith.mulf %169, %151 : vector<2x32xf32>
    %179 = arith.mulf %163, %171 : vector<2x32xf32>
    %180 = arith.addf %178, %179 : vector<2x32xf32>
    %181 = math.tanh %180 : vector<2x32xf32>
    %182 = arith.mulf %177, %181 : vector<2x32xf32>
    %c10_53 = arith.constant 10 : index
    %c0_54 = arith.constant 0 : index
    %183 = vector.load %arg12[%c10_53, %c0_54] : memref<16x32xf32, #tpu.memory_space<vmem>>, vector<2x32xf32>
    tpu.vector_store %arg12[%c10_53, %c0_54], %182 {strides = array<i32>} : memref<16x32xf32, #tpu.memory_space<vmem>>, vector<2x32xf32>,
    %c12 = arith.constant 12 : index
    %c0_55 = arith.constant 0 : index
    %184 = vector.load %arg10[%c12, %c0_55] : memref<16x128xf32, #tpu.memory_space<vmem>>, vector<2x128xf32>
    %cst_56 = arith.constant dense<0.000000e+00> : vector<2x128xf32>
    %185 = tpu.matmul %182, %7, %cst_56 {dimension_numbers = #tpu.dot_dimension_numbers<[1], [0], [0], [1], [0, 0, 1, 1], [], []>} : vector<2x32xf32>, vector<32x128xf32>, vector<2x128xf32> -> vector<2x128xf32>
    %186 = arith.addf %184, %185 : vector<2x128xf32>
    %187 = vector.extract_strided_slice %186 {offsets = [0, 0], sizes = [2, 32], strides = [1, 1]} : vector<2x128xf32> to vector<2x32xf32>
    %188 = arith.negf %187 : vector<2x32xf32>
    %189 = math.exp %188 : vector<2x32xf32>
    %cst_57 = arith.constant 1.000000e+00 : f32
    %190 = vector.broadcast %cst_57 : f32 to vector<2x32xf32>
    %191 = arith.addf %190, %189 : vector<2x32xf32>
    %192 = arith.divf %190, %191 : vector<2x32xf32>
    %193 = vector.extract_strided_slice %186 {offsets = [0, 32], sizes = [2, 32], strides = [1, 1]} : vector<2x128xf32> to vector<2x32xf32>
    %194 = arith.negf %193 : vector<2x32xf32>
    %195 = math.exp %194 : vector<2x32xf32>
    %cst_58 = arith.constant 1.000000e+00 : f32
    %196 = vector.broadcast %cst_58 : f32 to vector<2x32xf32>
    %197 = arith.addf %196, %195 : vector<2x32xf32>
    %198 = arith.divf %196, %197 : vector<2x32xf32>
    %199 = vector.extract_strided_slice %186 {offsets = [0, 64], sizes = [2, 32], strides = [1, 1]} : vector<2x128xf32> to vector<2x32xf32>
    %200 = math.tanh %199 : vector<2x32xf32>
    %201 = vector.extract_strided_slice %186 {offsets = [0, 96], sizes = [2, 32], strides = [1, 1]} : vector<2x128xf32> to vector<2x32xf32>
    %202 = arith.negf %201 : vector<2x32xf32>
    %203 = math.exp %202 : vector<2x32xf32>
    %cst_59 = arith.constant 1.000000e+00 : f32
    %204 = vector.broadcast %cst_59 : f32 to vector<2x32xf32>
    %205 = arith.addf %204, %203 : vector<2x32xf32>
    %206 = arith.divf %204, %205 : vector<2x32xf32>
    %207 = arith.mulf %198, %180 : vector<2x32xf32>
    %208 = arith.mulf %192, %200 : vector<2x32xf32>
    %209 = arith.addf %207, %208 : vector<2x32xf32>
    %210 = math.tanh %209 : vector<2x32xf32>
    %211 = arith.mulf %206, %210 : vector<2x32xf32>
    %c12_60 = arith.constant 12 : index
    %c0_61 = arith.constant 0 : index
    %212 = vector.load %arg12[%c12_60, %c0_61] : memref<16x32xf32, #tpu.memory_space<vmem>>, vector<2x32xf32>
    tpu.vector_store %arg12[%c12_60, %c0_61], %211 {strides = array<i32>} : memref<16x32xf32, #tpu.memory_space<vmem>>, vector<2x32xf32>,
    %c14 = arith.constant 14 : index
    %c0_62 = arith.constant 0 : index
    %213 = vector.load %arg10[%c14, %c0_62] : memref<16x128xf32, #tpu.memory_space<vmem>>, vector<2x128xf32>
    %cst_63 = arith.constant dense<0.000000e+00> : vector<2x128xf32>
    %214 = tpu.matmul %211, %7, %cst_63 {dimension_numbers = #tpu.dot_dimension_numbers<[1], [0], [0], [1], [0, 0, 1, 1], [], []>} : vector<2x32xf32>, vector<32x128xf32>, vector<2x128xf32> -> vector<2x128xf32>
    %215 = arith.addf %213, %214 : vector<2x128xf32>
    %216 = vector.extract_strided_slice %215 {offsets = [0, 0], sizes = [2, 32], strides = [1, 1]} : vector<2x128xf32> to vector<2x32xf32>
    %217 = arith.negf %216 : vector<2x32xf32>
    %218 = math.exp %217 : vector<2x32xf32>
    %cst_64 = arith.constant 1.000000e+00 : f32
    %219 = vector.broadcast %cst_64 : f32 to vector<2x32xf32>
    %220 = arith.addf %219, %218 : vector<2x32xf32>
    %221 = arith.divf %219, %220 : vector<2x32xf32>
    %222 = vector.extract_strided_slice %215 {offsets = [0, 32], sizes = [2, 32], strides = [1, 1]} : vector<2x128xf32> to vector<2x32xf32>
    %223 = arith.negf %222 : vector<2x32xf32>
    %224 = math.exp %223 : vector<2x32xf32>
    %cst_65 = arith.constant 1.000000e+00 : f32
    %225 = vector.broadcast %cst_65 : f32 to vector<2x32xf32>
    %226 = arith.addf %225, %224 : vector<2x32xf32>
    %227 = arith.divf %225, %226 : vector<2x32xf32>
    %228 = vector.extract_strided_slice %215 {offsets = [0, 64], sizes = [2, 32], strides = [1, 1]} : vector<2x128xf32> to vector<2x32xf32>
    %229 = math.tanh %228 : vector<2x32xf32>
    %230 = vector.extract_strided_slice %215 {offsets = [0, 96], sizes = [2, 32], strides = [1, 1]} : vector<2x128xf32> to vector<2x32xf32>
    %231 = arith.negf %230 : vector<2x32xf32>
    %232 = math.exp %231 : vector<2x32xf32>
    %cst_66 = arith.constant 1.000000e+00 : f32
    %233 = vector.broadcast %cst_66 : f32 to vector<2x32xf32>
    %234 = arith.addf %233, %232 : vector<2x32xf32>
    %235 = arith.divf %233, %234 : vector<2x32xf32>
    %236 = arith.mulf %227, %209 : vector<2x32xf32>
    %237 = arith.mulf %221, %229 : vector<2x32xf32>
    %238 = arith.addf %236, %237 : vector<2x32xf32>
    %239 = math.tanh %238 : vector<2x32xf32>
    %240 = arith.mulf %235, %239 : vector<2x32xf32>
    %c14_67 = arith.constant 14 : index
    %c0_68 = arith.constant 0 : index
    %241 = vector.load %arg12[%c14_67, %c0_68] : memref<16x32xf32, #tpu.memory_space<vmem>>, vector<2x32xf32>
    tpu.vector_store %arg12[%c14_67, %c0_68], %240 {strides = array<i32>} : memref<16x32xf32, #tpu.memory_space<vmem>>, vector<2x32xf32>,
    %c0_69 = arith.constant 0 : index
    %c0_70 = arith.constant 0 : index
    %242 = vector.load %arg12[%c0_69, %c0_70] : memref<16x32xf32, #tpu.memory_space<vmem>>, vector<16x32xf32>
    %c0_71 = arith.constant 0 : index
    %c0_72 = arith.constant 0 : index
    %243 = vector.load %arg4[%c0_71, %c0_72] : memref<32x128xf32, #tpu.memory_space<vmem>>, vector<32x128xf32>
    %cst_73 = arith.constant dense<0.000000e+00> : vector<16x128xf32>
    %244 = tpu.matmul %242, %243, %cst_73 {dimension_numbers = #tpu.dot_dimension_numbers<[1], [0], [0], [1], [0, 0, 1, 1], [], []>} : vector<16x32xf32>, vector<32x128xf32>, vector<16x128xf32> -> vector<16x128xf32>
    %c0_74 = arith.constant 0 : index
    %c0_75 = arith.constant 0 : index
    %245 = vector.load %arg6[%c0_74, %c0_75] : memref<1x128xf32, #tpu.memory_space<vmem>>, vector<1x128xf32>
    %246 = vector.broadcast %245 : vector<1x128xf32> to vector<16x128xf32>
    %247 = arith.addf %244, %246 : vector<16x128xf32>
    %c0_76 = arith.constant 0 : index
    %c0_77 = arith.constant 0 : index
    %248 = vector.load %arg11[%c0_76, %c0_77] : memref<16x128xf32, #tpu.memory_space<vmem>>, vector<16x128xf32>
    tpu.vector_store %arg11[%c0_76, %c0_77], %247 {strides = array<i32>} : memref<16x128xf32, #tpu.memory_space<vmem>>, vector<16x128xf32>,
    %c0_78 = arith.constant 0 : index
    %c0_79 = arith.constant 0 : index
    %249 = vector.load %arg11[%c0_78, %c0_79] : memref<16x128xf32, #tpu.memory_space<vmem>>, vector<2x128xf32>
    %cst_80 = arith.constant dense<0.000000e+00> : vector<2x128xf32>
    %250 = tpu.matmul %9, %8, %cst_80 {dimension_numbers = #tpu.dot_dimension_numbers<[1], [0], [0], [1], [0, 0, 1, 1], [], []>} : vector<2x32xf32>, vector<32x128xf32>, vector<2x128xf32> -> vector<2x128xf32>
    %251 = arith.addf %249, %250 : vector<2x128xf32>
    %252 = vector.extract_strided_slice %251 {offsets = [0, 0], sizes = [2, 32], strides = [1, 1]} : vector<2x128xf32> to vector<2x32xf32>
    %253 = arith.negf %252 : vector<2x32xf32>
    %254 = math.exp %253 : vector<2x32xf32>
    %cst_81 = arith.constant 1.000000e+00 : f32
    %255 = vector.broadcast %cst_81 : f32 to vector<2x32xf32>
    %256 = arith.addf %255, %254 : vector<2x32xf32>
    %257 = arith.divf %255, %256 : vector<2x32xf32>
    %258 = vector.extract_strided_slice %251 {offsets = [0, 32], sizes = [2, 32], strides = [1, 1]} : vector<2x128xf32> to vector<2x32xf32>
    %259 = arith.negf %258 : vector<2x32xf32>
    %260 = math.exp %259 : vector<2x32xf32>
    %cst_82 = arith.constant 1.000000e+00 : f32
    %261 = vector.broadcast %cst_82 : f32 to vector<2x32xf32>
    %262 = arith.addf %261, %260 : vector<2x32xf32>
    %263 = arith.divf %261, %262 : vector<2x32xf32>
    %264 = vector.extract_strided_slice %251 {offsets = [0, 64], sizes = [2, 32], strides = [1, 1]} : vector<2x128xf32> to vector<2x32xf32>
    %265 = math.tanh %264 : vector<2x32xf32>
    %266 = vector.extract_strided_slice %251 {offsets = [0, 96], sizes = [2, 32], strides = [1, 1]} : vector<2x128xf32> to vector<2x32xf32>
    %267 = arith.negf %266 : vector<2x32xf32>
    %268 = math.exp %267 : vector<2x32xf32>
    %cst_83 = arith.constant 1.000000e+00 : f32
    %269 = vector.broadcast %cst_83 : f32 to vector<2x32xf32>
    %270 = arith.addf %269, %268 : vector<2x32xf32>
    %271 = arith.divf %269, %270 : vector<2x32xf32>
    %272 = arith.mulf %263, %9 : vector<2x32xf32>
    %273 = arith.mulf %257, %265 : vector<2x32xf32>
    %274 = arith.addf %272, %273 : vector<2x32xf32>
    %275 = math.tanh %274 : vector<2x32xf32>
    %276 = arith.mulf %271, %275 : vector<2x32xf32>
    %c2_84 = arith.constant 2 : index
    %c0_85 = arith.constant 0 : index
    %277 = vector.load %arg11[%c2_84, %c0_85] : memref<16x128xf32, #tpu.memory_space<vmem>>, vector<2x128xf32>
    %cst_86 = arith.constant dense<0.000000e+00> : vector<2x128xf32>
    %278 = tpu.matmul %276, %8, %cst_86 {dimension_numbers = #tpu.dot_dimension_numbers<[1], [0], [0], [1], [0, 0, 1, 1], [], []>} : vector<2x32xf32>, vector<32x128xf32>, vector<2x128xf32> -> vector<2x128xf32>
    %279 = arith.addf %277, %278 : vector<2x128xf32>
    %280 = vector.extract_strided_slice %279 {offsets = [0, 0], sizes = [2, 32], strides = [1, 1]} : vector<2x128xf32> to vector<2x32xf32>
    %281 = arith.negf %280 : vector<2x32xf32>
    %282 = math.exp %281 : vector<2x32xf32>
    %cst_87 = arith.constant 1.000000e+00 : f32
    %283 = vector.broadcast %cst_87 : f32 to vector<2x32xf32>
    %284 = arith.addf %283, %282 : vector<2x32xf32>
    %285 = arith.divf %283, %284 : vector<2x32xf32>
    %286 = vector.extract_strided_slice %279 {offsets = [0, 32], sizes = [2, 32], strides = [1, 1]} : vector<2x128xf32> to vector<2x32xf32>
    %287 = arith.negf %286 : vector<2x32xf32>
    %288 = math.exp %287 : vector<2x32xf32>
    %cst_88 = arith.constant 1.000000e+00 : f32
    %289 = vector.broadcast %cst_88 : f32 to vector<2x32xf32>
    %290 = arith.addf %289, %288 : vector<2x32xf32>
    %291 = arith.divf %289, %290 : vector<2x32xf32>
    %292 = vector.extract_strided_slice %279 {offsets = [0, 64], sizes = [2, 32], strides = [1, 1]} : vector<2x128xf32> to vector<2x32xf32>
    %293 = math.tanh %292 : vector<2x32xf32>
    %294 = vector.extract_strided_slice %279 {offsets = [0, 96], sizes = [2, 32], strides = [1, 1]} : vector<2x128xf32> to vector<2x32xf32>
    %295 = arith.negf %294 : vector<2x32xf32>
    %296 = math.exp %295 : vector<2x32xf32>
    %cst_89 = arith.constant 1.000000e+00 : f32
    %297 = vector.broadcast %cst_89 : f32 to vector<2x32xf32>
    %298 = arith.addf %297, %296 : vector<2x32xf32>
    %299 = arith.divf %297, %298 : vector<2x32xf32>
    %300 = arith.mulf %291, %274 : vector<2x32xf32>
    %301 = arith.mulf %285, %293 : vector<2x32xf32>
    %302 = arith.addf %300, %301 : vector<2x32xf32>
    %303 = math.tanh %302 : vector<2x32xf32>
    %304 = arith.mulf %299, %303 : vector<2x32xf32>
    %c4_90 = arith.constant 4 : index
    %c0_91 = arith.constant 0 : index
    %305 = vector.load %arg11[%c4_90, %c0_91] : memref<16x128xf32, #tpu.memory_space<vmem>>, vector<2x128xf32>
    %cst_92 = arith.constant dense<0.000000e+00> : vector<2x128xf32>
    %306 = tpu.matmul %304, %8, %cst_92 {dimension_numbers = #tpu.dot_dimension_numbers<[1], [0], [0], [1], [0, 0, 1, 1], [], []>} : vector<2x32xf32>, vector<32x128xf32>, vector<2x128xf32> -> vector<2x128xf32>
    %307 = arith.addf %305, %306 : vector<2x128xf32>
    %308 = vector.extract_strided_slice %307 {offsets = [0, 0], sizes = [2, 32], strides = [1, 1]} : vector<2x128xf32> to vector<2x32xf32>
    %309 = arith.negf %308 : vector<2x32xf32>
    %310 = math.exp %309 : vector<2x32xf32>
    %cst_93 = arith.constant 1.000000e+00 : f32
    %311 = vector.broadcast %cst_93 : f32 to vector<2x32xf32>
    %312 = arith.addf %311, %310 : vector<2x32xf32>
    %313 = arith.divf %311, %312 : vector<2x32xf32>
    %314 = vector.extract_strided_slice %307 {offsets = [0, 32], sizes = [2, 32], strides = [1, 1]} : vector<2x128xf32> to vector<2x32xf32>
    %315 = arith.negf %314 : vector<2x32xf32>
    %316 = math.exp %315 : vector<2x32xf32>
    %cst_94 = arith.constant 1.000000e+00 : f32
    %317 = vector.broadcast %cst_94 : f32 to vector<2x32xf32>
    %318 = arith.addf %317, %316 : vector<2x32xf32>
    %319 = arith.divf %317, %318 : vector<2x32xf32>
    %320 = vector.extract_strided_slice %307 {offsets = [0, 64], sizes = [2, 32], strides = [1, 1]} : vector<2x128xf32> to vector<2x32xf32>
    %321 = math.tanh %320 : vector<2x32xf32>
    %322 = vector.extract_strided_slice %307 {offsets = [0, 96], sizes = [2, 32], strides = [1, 1]} : vector<2x128xf32> to vector<2x32xf32>
    %323 = arith.negf %322 : vector<2x32xf32>
    %324 = math.exp %323 : vector<2x32xf32>
    %cst_95 = arith.constant 1.000000e+00 : f32
    %325 = vector.broadcast %cst_95 : f32 to vector<2x32xf32>
    %326 = arith.addf %325, %324 : vector<2x32xf32>
    %327 = arith.divf %325, %326 : vector<2x32xf32>
    %328 = arith.mulf %319, %302 : vector<2x32xf32>
    %329 = arith.mulf %313, %321 : vector<2x32xf32>
    %330 = arith.addf %328, %329 : vector<2x32xf32>
    %331 = math.tanh %330 : vector<2x32xf32>
    %332 = arith.mulf %327, %331 : vector<2x32xf32>
    %c6_96 = arith.constant 6 : index
    %c0_97 = arith.constant 0 : index
    %333 = vector.load %arg11[%c6_96, %c0_97] : memref<16x128xf32, #tpu.memory_space<vmem>>, vector<2x128xf32>
    %cst_98 = arith.constant dense<0.000000e+00> : vector<2x128xf32>
    %334 = tpu.matmul %332, %8, %cst_98 {dimension_numbers = #tpu.dot_dimension_numbers<[1], [0], [0], [1], [0, 0, 1, 1], [], []>} : vector<2x32xf32>, vector<32x128xf32>, vector<2x128xf32> -> vector<2x128xf32>
    %335 = arith.addf %333, %334 : vector<2x128xf32>
    %336 = vector.extract_strided_slice %335 {offsets = [0, 0], sizes = [2, 32], strides = [1, 1]} : vector<2x128xf32> to vector<2x32xf32>
    %337 = arith.negf %336 : vector<2x32xf32>
    %338 = math.exp %337 : vector<2x32xf32>
    %cst_99 = arith.constant 1.000000e+00 : f32
    %339 = vector.broadcast %cst_99 : f32 to vector<2x32xf32>
    %340 = arith.addf %339, %338 : vector<2x32xf32>
    %341 = arith.divf %339, %340 : vector<2x32xf32>
    %342 = vector.extract_strided_slice %335 {offsets = [0, 32], sizes = [2, 32], strides = [1, 1]} : vector<2x128xf32> to vector<2x32xf32>
    %343 = arith.negf %342 : vector<2x32xf32>
    %344 = math.exp %343 : vector<2x32xf32>
    %cst_100 = arith.constant 1.000000e+00 : f32
    %345 = vector.broadcast %cst_100 : f32 to vector<2x32xf32>
    %346 = arith.addf %345, %344 : vector<2x32xf32>
    %347 = arith.divf %345, %346 : vector<2x32xf32>
    %348 = vector.extract_strided_slice %335 {offsets = [0, 64], sizes = [2, 32], strides = [1, 1]} : vector<2x128xf32> to vector<2x32xf32>
    %349 = math.tanh %348 : vector<2x32xf32>
    %350 = vector.extract_strided_slice %335 {offsets = [0, 96], sizes = [2, 32], strides = [1, 1]} : vector<2x128xf32> to vector<2x32xf32>
    %351 = arith.negf %350 : vector<2x32xf32>
    %352 = math.exp %351 : vector<2x32xf32>
    %cst_101 = arith.constant 1.000000e+00 : f32
    %353 = vector.broadcast %cst_101 : f32 to vector<2x32xf32>
    %354 = arith.addf %353, %352 : vector<2x32xf32>
    %355 = arith.divf %353, %354 : vector<2x32xf32>
    %356 = arith.mulf %347, %330 : vector<2x32xf32>
    %357 = arith.mulf %341, %349 : vector<2x32xf32>
    %358 = arith.addf %356, %357 : vector<2x32xf32>
    %359 = math.tanh %358 : vector<2x32xf32>
    %360 = arith.mulf %355, %359 : vector<2x32xf32>
    %c8_102 = arith.constant 8 : index
    %c0_103 = arith.constant 0 : index
    %361 = vector.load %arg11[%c8_102, %c0_103] : memref<16x128xf32, #tpu.memory_space<vmem>>, vector<2x128xf32>
    %cst_104 = arith.constant dense<0.000000e+00> : vector<2x128xf32>
    %362 = tpu.matmul %360, %8, %cst_104 {dimension_numbers = #tpu.dot_dimension_numbers<[1], [0], [0], [1], [0, 0, 1, 1], [], []>} : vector<2x32xf32>, vector<32x128xf32>, vector<2x128xf32> -> vector<2x128xf32>
    %363 = arith.addf %361, %362 : vector<2x128xf32>
    %364 = vector.extract_strided_slice %363 {offsets = [0, 0], sizes = [2, 32], strides = [1, 1]} : vector<2x128xf32> to vector<2x32xf32>
    %365 = arith.negf %364 : vector<2x32xf32>
    %366 = math.exp %365 : vector<2x32xf32>
    %cst_105 = arith.constant 1.000000e+00 : f32
    %367 = vector.broadcast %cst_105 : f32 to vector<2x32xf32>
    %368 = arith.addf %367, %366 : vector<2x32xf32>
    %369 = arith.divf %367, %368 : vector<2x32xf32>
    %370 = vector.extract_strided_slice %363 {offsets = [0, 32], sizes = [2, 32], strides = [1, 1]} : vector<2x128xf32> to vector<2x32xf32>
    %371 = arith.negf %370 : vector<2x32xf32>
    %372 = math.exp %371 : vector<2x32xf32>
    %cst_106 = arith.constant 1.000000e+00 : f32
    %373 = vector.broadcast %cst_106 : f32 to vector<2x32xf32>
    %374 = arith.addf %373, %372 : vector<2x32xf32>
    %375 = arith.divf %373, %374 : vector<2x32xf32>
    %376 = vector.extract_strided_slice %363 {offsets = [0, 64], sizes = [2, 32], strides = [1, 1]} : vector<2x128xf32> to vector<2x32xf32>
    %377 = math.tanh %376 : vector<2x32xf32>
    %378 = vector.extract_strided_slice %363 {offsets = [0, 96], sizes = [2, 32], strides = [1, 1]} : vector<2x128xf32> to vector<2x32xf32>
    %379 = arith.negf %378 : vector<2x32xf32>
    %380 = math.exp %379 : vector<2x32xf32>
    %cst_107 = arith.constant 1.000000e+00 : f32
    %381 = vector.broadcast %cst_107 : f32 to vector<2x32xf32>
    %382 = arith.addf %381, %380 : vector<2x32xf32>
    %383 = arith.divf %381, %382 : vector<2x32xf32>
    %384 = arith.mulf %375, %358 : vector<2x32xf32>
    %385 = arith.mulf %369, %377 : vector<2x32xf32>
    %386 = arith.addf %384, %385 : vector<2x32xf32>
    %387 = math.tanh %386 : vector<2x32xf32>
    %388 = arith.mulf %383, %387 : vector<2x32xf32>
    %c10_108 = arith.constant 10 : index
    %c0_109 = arith.constant 0 : index
    %389 = vector.load %arg11[%c10_108, %c0_109] : memref<16x128xf32, #tpu.memory_space<vmem>>, vector<2x128xf32>
    %cst_110 = arith.constant dense<0.000000e+00> : vector<2x128xf32>
    %390 = tpu.matmul %388, %8, %cst_110 {dimension_numbers = #tpu.dot_dimension_numbers<[1], [0], [0], [1], [0, 0, 1, 1], [], []>} : vector<2x32xf32>, vector<32x128xf32>, vector<2x128xf32> -> vector<2x128xf32>
    %391 = arith.addf %389, %390 : vector<2x128xf32>
    %392 = vector.extract_strided_slice %391 {offsets = [0, 0], sizes = [2, 32], strides = [1, 1]} : vector<2x128xf32> to vector<2x32xf32>
    %393 = arith.negf %392 : vector<2x32xf32>
    %394 = math.exp %393 : vector<2x32xf32>
    %cst_111 = arith.constant 1.000000e+00 : f32
    %395 = vector.broadcast %cst_111 : f32 to vector<2x32xf32>
    %396 = arith.addf %395, %394 : vector<2x32xf32>
    %397 = arith.divf %395, %396 : vector<2x32xf32>
    %398 = vector.extract_strided_slice %391 {offsets = [0, 32], sizes = [2, 32], strides = [1, 1]} : vector<2x128xf32> to vector<2x32xf32>
    %399 = arith.negf %398 : vector<2x32xf32>
    %400 = math.exp %399 : vector<2x32xf32>
    %cst_112 = arith.constant 1.000000e+00 : f32
    %401 = vector.broadcast %cst_112 : f32 to vector<2x32xf32>
    %402 = arith.addf %401, %400 : vector<2x32xf32>
    %403 = arith.divf %401, %402 : vector<2x32xf32>
    %404 = vector.extract_strided_slice %391 {offsets = [0, 64], sizes = [2, 32], strides = [1, 1]} : vector<2x128xf32> to vector<2x32xf32>
    %405 = math.tanh %404 : vector<2x32xf32>
    %406 = vector.extract_strided_slice %391 {offsets = [0, 96], sizes = [2, 32], strides = [1, 1]} : vector<2x128xf32> to vector<2x32xf32>
    %407 = arith.negf %406 : vector<2x32xf32>
    %408 = math.exp %407 : vector<2x32xf32>
    %cst_113 = arith.constant 1.000000e+00 : f32
    %409 = vector.broadcast %cst_113 : f32 to vector<2x32xf32>
    %410 = arith.addf %409, %408 : vector<2x32xf32>
    %411 = arith.divf %409, %410 : vector<2x32xf32>
    %412 = arith.mulf %403, %386 : vector<2x32xf32>
    %413 = arith.mulf %397, %405 : vector<2x32xf32>
    %414 = arith.addf %412, %413 : vector<2x32xf32>
    %415 = math.tanh %414 : vector<2x32xf32>
    %416 = arith.mulf %411, %415 : vector<2x32xf32>
    %c12_114 = arith.constant 12 : index
    %c0_115 = arith.constant 0 : index
    %417 = vector.load %arg11[%c12_114, %c0_115] : memref<16x128xf32, #tpu.memory_space<vmem>>, vector<2x128xf32>
    %cst_116 = arith.constant dense<0.000000e+00> : vector<2x128xf32>
    %418 = tpu.matmul %416, %8, %cst_116 {dimension_numbers = #tpu.dot_dimension_numbers<[1], [0], [0], [1], [0, 0, 1, 1], [], []>} : vector<2x32xf32>, vector<32x128xf32>, vector<2x128xf32> -> vector<2x128xf32>
    %419 = arith.addf %417, %418 : vector<2x128xf32>
    %420 = vector.extract_strided_slice %419 {offsets = [0, 0], sizes = [2, 32], strides = [1, 1]} : vector<2x128xf32> to vector<2x32xf32>
    %421 = arith.negf %420 : vector<2x32xf32>
    %422 = math.exp %421 : vector<2x32xf32>
    %cst_117 = arith.constant 1.000000e+00 : f32
    %423 = vector.broadcast %cst_117 : f32 to vector<2x32xf32>
    %424 = arith.addf %423, %422 : vector<2x32xf32>
    %425 = arith.divf %423, %424 : vector<2x32xf32>
    %426 = vector.extract_strided_slice %419 {offsets = [0, 32], sizes = [2, 32], strides = [1, 1]} : vector<2x128xf32> to vector<2x32xf32>
    %427 = arith.negf %426 : vector<2x32xf32>
    %428 = math.exp %427 : vector<2x32xf32>
    %cst_118 = arith.constant 1.000000e+00 : f32
    %429 = vector.broadcast %cst_118 : f32 to vector<2x32xf32>
    %430 = arith.addf %429, %428 : vector<2x32xf32>
    %431 = arith.divf %429, %430 : vector<2x32xf32>
    %432 = vector.extract_strided_slice %419 {offsets = [0, 64], sizes = [2, 32], strides = [1, 1]} : vector<2x128xf32> to vector<2x32xf32>
    %433 = math.tanh %432 : vector<2x32xf32>
    %434 = vector.extract_strided_slice %419 {offsets = [0, 96], sizes = [2, 32], strides = [1, 1]} : vector<2x128xf32> to vector<2x32xf32>
    %435 = arith.negf %434 : vector<2x32xf32>
    %436 = math.exp %435 : vector<2x32xf32>
    %cst_119 = arith.constant 1.000000e+00 : f32
    %437 = vector.broadcast %cst_119 : f32 to vector<2x32xf32>
    %438 = arith.addf %437, %436 : vector<2x32xf32>
    %439 = arith.divf %437, %438 : vector<2x32xf32>
    %440 = arith.mulf %431, %414 : vector<2x32xf32>
    %441 = arith.mulf %425, %433 : vector<2x32xf32>
    %442 = arith.addf %440, %441 : vector<2x32xf32>
    %443 = math.tanh %442 : vector<2x32xf32>
    %444 = arith.mulf %439, %443 : vector<2x32xf32>
    %c14_120 = arith.constant 14 : index
    %c0_121 = arith.constant 0 : index
    %445 = vector.load %arg11[%c14_120, %c0_121] : memref<16x128xf32, #tpu.memory_space<vmem>>, vector<2x128xf32>
    %cst_122 = arith.constant dense<0.000000e+00> : vector<2x128xf32>
    %446 = tpu.matmul %444, %8, %cst_122 {dimension_numbers = #tpu.dot_dimension_numbers<[1], [0], [0], [1], [0, 0, 1, 1], [], []>} : vector<2x32xf32>, vector<32x128xf32>, vector<2x128xf32> -> vector<2x128xf32>
    %447 = arith.addf %445, %446 : vector<2x128xf32>
    %448 = vector.extract_strided_slice %447 {offsets = [0, 0], sizes = [2, 32], strides = [1, 1]} : vector<2x128xf32> to vector<2x32xf32>
    %449 = arith.negf %448 : vector<2x32xf32>
    %450 = math.exp %449 : vector<2x32xf32>
    %cst_123 = arith.constant 1.000000e+00 : f32
    %451 = vector.broadcast %cst_123 : f32 to vector<2x32xf32>
    %452 = arith.addf %451, %450 : vector<2x32xf32>
    %453 = arith.divf %451, %452 : vector<2x32xf32>
    %454 = vector.extract_strided_slice %447 {offsets = [0, 32], sizes = [2, 32], strides = [1, 1]} : vector<2x128xf32> to vector<2x32xf32>
    %455 = arith.negf %454 : vector<2x32xf32>
    %456 = math.exp %455 : vector<2x32xf32>
    %cst_124 = arith.constant 1.000000e+00 : f32
    %457 = vector.broadcast %cst_124 : f32 to vector<2x32xf32>
    %458 = arith.addf %457, %456 : vector<2x32xf32>
    %459 = arith.divf %457, %458 : vector<2x32xf32>
    %460 = vector.extract_strided_slice %447 {offsets = [0, 64], sizes = [2, 32], strides = [1, 1]} : vector<2x128xf32> to vector<2x32xf32>
    %461 = math.tanh %460 : vector<2x32xf32>
    %462 = vector.extract_strided_slice %447 {offsets = [0, 96], sizes = [2, 32], strides = [1, 1]} : vector<2x128xf32> to vector<2x32xf32>
    %463 = arith.negf %462 : vector<2x32xf32>
    %464 = math.exp %463 : vector<2x32xf32>
    %cst_125 = arith.constant 1.000000e+00 : f32
    %465 = vector.broadcast %cst_125 : f32 to vector<2x32xf32>
    %466 = arith.addf %465, %464 : vector<2x32xf32>
    %467 = arith.divf %465, %466 : vector<2x32xf32>
    %468 = arith.mulf %459, %442 : vector<2x32xf32>
    %469 = arith.mulf %453, %461 : vector<2x32xf32>
    %470 = arith.addf %468, %469 : vector<2x32xf32>
    %471 = math.tanh %470 : vector<2x32xf32>
    %472 = arith.mulf %467, %471 : vector<2x32xf32>
    %c0_126 = arith.constant 0 : index
    %c0_127 = arith.constant 0 : index
    %473 = vector.load %arg7[%c0_126, %c0_127] : memref<32x128xf32, #tpu.memory_space<vmem>>, vector<32x128xf32>
    %cst_128 = arith.constant dense<0.000000e+00> : vector<2x128xf32>
    %474 = tpu.matmul %472, %473, %cst_128 {dimension_numbers = #tpu.dot_dimension_numbers<[1], [0], [0], [1], [0, 0, 1, 1], [], []>} : vector<2x32xf32>, vector<32x128xf32>, vector<2x128xf32> -> vector<2x128xf32>
    %c0_129 = arith.constant 0 : index
    %c0_130 = arith.constant 0 : index
    %475 = vector.load %arg8[%c0_129, %c0_130] : memref<1x128xf32, #tpu.memory_space<vmem>>, vector<1x128xf32>
    %476 = vector.broadcast %475 : vector<1x128xf32> to vector<2x128xf32>
    %477 = arith.addf %474, %476 : vector<2x128xf32>
    %c0_131 = arith.constant 0 : index
    %c0_132 = arith.constant 0 : index
    %478 = vector.load %arg9[%c0_131, %c0_132] : memref<2x128xf32, #tpu.memory_space<vmem>>, vector<2x128xf32>
    tpu.vector_store %arg9[%c0_131, %c0_132], %477 {strides = array<i32>} : memref<2x128xf32, #tpu.memory_space<vmem>>, vector<2x128xf32>,
    return
  }
}

</mosaic_0001>

<bundles_post_ra>
// kernel: tpu_custom_call.1
= control target key start
LH: loop header
LB: loop body
LE: loop exit
PB: predicated region body
PF: predicated region fallthrough
CT: control target
= control target key end

     0   :  { %14 = vsyncpa [#allocation6], 0  ;;  %s3060_s0 = inlined_call_operand.vmem [shape: f32[16,4], index: 0, kind: input, shape index: {}]   ;;  %s3061_s1 = inlined_call_operand.hbm [shape: f32[4,128], index: 1, kind: input, shape index: {}]   ;;  %s3062_s2 = inlined_call_operand.hbm [shape: f32[32,128], index: 2, kind: input, shape index: {}]   ;;  %s3063_s3 = inlined_call_operand.hbm [shape: f32[1,128], index: 3, kind: input, shape index: {}]   ;;  %s3064_s4 = inlined_call_operand.hbm [shape: f32[32,128], index: 4, kind: input, shape index: {}]   ;;  %s3065_s5 = inlined_call_operand.hbm [shape: f32[32,128], index: 5, kind: input, shape index: {}]   ;;  %s3066_s6 = inlined_call_operand.hbm [shape: f32[1,128], index: 6, kind: input, shape index: {}]   ;;  %s3067_s7 = inlined_call_operand.vmem [shape: f32[32,128], index: 7, kind: input, shape index: {}]   ;;  %s3068_s8 = inlined_call_operand.vmem [shape: f32[1,128], index: 8, kind: input, shape index: {}]   ;;  %s3069_s9 = inlined_call_operand.hbm [shape: f32[2,128], index: 9, kind: output, shape index: {}]  }
   0x1   :  { %15 = vsyncpa [#allocation9], 0 }
   0x2   :  { %16 = vsyncpa [#allocation12], 0 }
   0x3   :  { %17 = vsyncpa [#allocation15], 0 }
   0x4   :  { %18 = vsyncpa [#allocation7], 0  ;;  %s2673_s30 = smov [#allocation8]  }
   0x5   :  { %s36_s10 = sshll.u32 %s2673_s30, 4  ;;  %s37_s10 = int_to_ptr.vmem [resolvable:$true] %s36_s10 }
   0x6   :  { %s2531_s11 = scalar_lea.vmem %s37_s10, 512  ;;  %p2536_p1 = scmp.lt.s32.totalorder %s37_s10, %s37_s10 }
   0x7   :  { %p2532_p0 = scmp.ne.s32.totalorder %s37_s10, %s2531_s11  ;;  %p2537_p2 = scmp.lt.s32.totalorder %s2531_s11, %s2531_s11 }
   0x9   :  { %p2538_p3 = por %p2537_p2, %p2536_p1 }
   0xb   :  { %p2539_p4 = pnand %p2538_p3, %p2532_p0 }
   0xd   :  { %2542 = shalt.err (!%p2539_p4)
}
   0xe   :  { %s2674_s12 = smov 128   ;;  %s2675_s13 = smov 8  }
   0xf   :  { %42 = dma.hbm_to_vmem [thread:$0]  %s3062_s2, 512, %s37_s10, [#allocation9], %s2674_s12, %s2674_s12, %s2675_s13  }
  0x10   :  { %s2676_s16 = smov [#allocation11]   ;;  %s2677_s18 = smov [#allocation5]  }
  0x11   :  { %s58_s17 = sshll.u32 %s2676_s16, 4  ;;  %s27_s19 = sshll.u32 %s2677_s18, 4  ;;  %s59_s17 = int_to_ptr.vmem [resolvable:$true] %s58_s17  ;;  %s28_s19 = int_to_ptr.vmem [resolvable:$true] %s27_s19 }
  0x12   :  { %s2551_s20 = scalar_lea.vmem %s59_s17, 512  ;;  %p2556_p6 = scmp.lt.s32.totalorder %s59_s17, %s59_s17 }
  0x13   :  { %p2552_p5 = scmp.ne.s32.totalorder %s59_s17, %s2551_s20  ;;  %p2557_p7 = scmp.lt.s32.totalorder %s2551_s20, %s2551_s20 }
  0x15   :  { %p2558_p8 = por %p2557_p7, %p2556_p6 }
  0x17   :  { %p2559_p9 = pnand %p2558_p8, %p2552_p5 }
  0x19   :  { %2562 = shalt.err (!%p2559_p9)
}
  0x1a   :  { %64 = dma.hbm_to_vmem [thread:$0]  %s3064_s4, 512, %s59_s17, [#allocation12], %s2674_s12, %s2674_s12, %s2675_s13  }
  0x1b   :  { %s2571_s2 = scalar_lea.vmem %s28_s19, 64  ;;  %p2576_p11 = scmp.lt.s32.totalorder %s28_s19, %s28_s19 }
  0x1c   :  { %p2572_p10 = scmp.ne.s32.totalorder %s28_s19, %s2571_s2  ;;  %p2577_p12 = scmp.lt.s32.totalorder %s2571_s2, %s2571_s2 }
  0x1e   :  { %p2578_p13 = por %p2577_p12, %p2576_p11 }
  0x20   :  { %p2579_p0 = pnand %p2578_p13, %p2572_p10 }
  0x22   :  { %2582 = shalt.err (!%p2579_p0)
}
  0x23   :  { %30 = dma.hbm_to_vmem [thread:$0]  %s3061_s1, 64, %s28_s19, [#allocation6]  }
  0x24   :  { %s2678_s25 = smov [#allocation10]   ;;  %s2679_s27 = smov [#allocation13]  }
  0x25   :  { %s49_s26 = sshll.u32 %s2678_s25, 4  ;;  %s70_s28 = sshll.u32 %s2679_s27, 4  ;;  %s50_s26 = int_to_ptr.vmem [resolvable:$true] %s49_s26  ;;  %s71_s28 = int_to_ptr.vmem [resolvable:$true] %s70_s28 }
  0x26   :  { %s2591_s29 = scalar_lea.vmem %s50_s26, 16  ;;  %s2595_s4 = scalar_lea.vmem %s50_s26, 32 }
  0x27   :  { %p2592_p1 = scmp.ne.s32.totalorder %s50_s26, %s2591_s29  ;;  %p2596_p2 = scmp.lt.s32.totalorder %s50_s26, %s50_s26 }
  0x28   :  { %p2597_p3 = scmp.lt.s32.totalorder %s2595_s4, %s2591_s29 }
  0x2a   :  { %p2598_p4 = por %p2597_p3, %p2596_p2 }
  0x2c   :  { %p2599_p5 = pnand %p2598_p4, %p2592_p1 }
  0x2e   :  { %2602 = shalt.err (!%p2599_p5)
}
  0x2f   :  { %52 = dma.hbm_to_vmem [thread:$0]  %s3063_s3, 16, %s50_s26, [#allocation9]  }
  0x30   :  { %s2611_s11 = scalar_lea.vmem %s71_s28, 512  ;;  %p2616_p7 = scmp.lt.s32.totalorder %s71_s28, %s71_s28 }
  0x31   :  { %p2612_p6 = scmp.ne.s32.totalorder %s71_s28, %s2611_s11  ;;  %p2617_p8 = scmp.lt.s32.totalorder %s2611_s11, %s2611_s11 }
  0x33   :  { %p2618_p9 = por %p2617_p8, %p2616_p7 }
  0x35   :  { %p2619_p10 = pnand %p2618_p9, %p2612_p6 }
  0x37   :  { %2622 = shalt.err (!%p2619_p10)
}
  0x38   :  { %76 = dma.hbm_to_vmem [thread:$0]  %s3065_s5, 512, %s71_s28, [#allocation12], %s2674_s12, %s2674_s12, %s2675_s13  }
  0x39   :  { %s2680_s15 = smov [#allocation14]  }
  0x3a   :  { %s83_s16 = sshll.u32 %s2680_s15, 4  ;;  %s84_s16 = int_to_ptr.vmem [resolvable:$true] %s83_s16 }
  0x3b   :  { %s2631_s17 = scalar_lea.vmem %s84_s16, 16  ;;  %s2635_s3 = scalar_lea.vmem %s84_s16, 32 }
  0x3c   :  { %p2632_p11 = scmp.ne.s32.totalorder %s84_s16, %s2631_s17  ;;  %p2636_p12 = scmp.lt.s32.totalorder %s84_s16, %s84_s16 }
  0x3d   :  { %p2637_p13 = scmp.lt.s32.totalorder %s2635_s3, %s2631_s17 }
  0x3f   :  { %p2638_p0 = por %p2637_p13, %p2636_p12 }
  0x41   :  { %p2639_p1 = pnand %p2638_p0, %p2632_p11 }
  0x43   :  { %2642 = shalt.err (!%p2639_p1)
}
  0x44   :  { %86 = dma.hbm_to_vmem [thread:$0]  %s3066_s6, 16, %s84_s16, [#allocation15]  }
  0x45   :  { %2663 = dma.done.wait [#allocation6], 64  }
  0x46   :  { %2664 = vsyncadd [#allocation6], 4294967232 }
  0x47   :  { %2665 = dma.done.wait [#allocation9], 528  }
  0x48   :  { %2666 = vsyncadd [#allocation9], 4294966768 }
  0x49   :  { %2667 = dma.done.wait [#allocation12], 1024  }
  0x4a   :  { %2668 = vsyncadd [#allocation12], 4294966272 }
  0x4b   :  { %2669 = dma.done.wait [#allocation15], 16  }
  0x4c   :  { %2670 = vsyncadd [#allocation15], 4294967280  ;;  %v2681_v0 = vmov 0.0   ;;  %vm2682_vm0 = vmmov 0   ;;  %vm126_vm1 = vcmask 1043456   ;;  %vm119_vm2 = vcmask 31744  }
  0x4d   :  { %2184 = vmatprep.subr.mxu1 %v2681_v0  ;;  %2192 = vmatprep.mubr.msk.f32.mxu1 %vm2682_vm0, %v2681_v0  ;;  %v111_v1 = vld [vmem:[#allocation5] sm:$0xf]  ;;  %v109_v2 = vld [vmem:[%s3060_s0] sm:$0xff]  ;;  %v110_v3 = vld [vmem:[%s3060_s0 + $0x8] sm:$0xff]  ;;  %s2683_s0 = smov 64   ;;  %s2684_s20 = smov 32  }
  0x4e   :  { %2179 = vmatprep.subr.msk.mxu0 %vm126_vm1, %v111_v1  ;;  %2181 = vmatprep.mubr.msk.f32.mxu0 %vm119_vm2, %v109_v2  ;;  %v2772_v4 = vld [vmem:[#allocation8 + $0x18] sm:$0xff]  ;;  %v2774_v5 = vld [vmem:[#allocation8 + $0x10] sm:$0xff]  ;;  %v2778_v6 = vld [vmem:[#allocation8 + $0x8] sm:$0xff]  ;;  %vm319_vm3 = vcmask 254976   ;;  %vm216_vm4 = vcmask 261120   ;;  %s2685_s4 = smov [#allocation16]  }
  0x4f   :  { %2180 = vmatpush3.msk.msra.mxu0 %vm126_vm1, %v111_v1  ;;  %2185 = vmatpush3.msra.mxu1 %v2772_v4  ;;  %v2783_v7 = vld [vmem:[#allocation8] sm:$0xff] }
  0x50   :  { %2182 = vmatmul.mubr.msk.f32.vlgmr.msra.gmra.mxu0 %vm119_vm2, %v110_v3  ;;  %2186 = vmatprep.subr.mxu1 %v2681_v0  ;;  %v2046_v8 = vld [vmem:[#allocation10] ss:$0 sm:$0xff] }
  0x51   :  { %2187 = vmatpush3.msra.mxu1 %v2774_v5  ;;  %2195 = vmatprep.subr.mxu0 %v2681_v0 }
  0x52   :  { %2188 = vmatprep.subr.mxu1 %v2681_v0  ;;  %2196 = vmatpush3.msra.mxu0 %v2772_v4 }
  0x53   :  { %2189 = vmatpush3.msra.mxu1 %v2778_v6  ;;  %2197 = vmatprep.subr.mxu0 %v2681_v0 }
  0x54   :  { %2190 = vmatprep.subr.mxu1 %v2681_v0  ;;  %2198 = vmatpush3.msra.mxu0 %v2774_v5 }
  0x55   :  { %2191 = vmatpush3.msra.mxu1 %v2783_v7  ;;  %2199 = vmatprep.subr.mxu0 %v2681_v0 }
  0x56   :  { %2193 = vmatmul.mubr.f32.vlgmr.msra.gmra.mxu1 %v2681_v0  ;;  %2200 = vmatpush3.msra.mxu0 %v2778_v6 }
  0x57   :  { %2201 = vmatprep.subr.mxu0 %v2681_v0  ;;  %2203 = vmatprep.mubr.msk.f32.mxu0 %vm2682_vm0, %v2681_v0 }
  0x58   :  { %2202 = vmatpush3.msra.mxu0 %v2783_v7  ;;  %2206 = vmatprep.subr.mxu1 %v2681_v0 }
  0x59   :  { %2207 = vmatpush3.msra.mxu1 %v2772_v4  ;;  %2214 = vmatprep.mubr.msk.f32.mxu1 %vm2682_vm0, %v2681_v0 }
  0x5a   :  { %2208 = vmatprep.subr.mxu1 %v2681_v0  ;;  %2217 = vmatprep.subr.mxu0 %v2681_v0 }
  0x5b   :  { %2209 = vmatpush3.msra.mxu1 %v2774_v5 }
  0x5c   :  { %2210 = vmatprep.subr.mxu1 %v2681_v0 }
  0x5d   :  { %2211 = vmatpush3.msra.mxu1 %v2778_v6 }
  0x5e   :  { %2212 = vmatprep.subr.mxu1 %v2681_v0 }
  0x5f   :  { %2213 = vmatpush3.msra.mxu1 %v2783_v7 }
  0x60   :  { %2228 = vmatprep.subr.mxu1 %v2681_v0 }
 0x110   :  { %v2183_v9 = vpop.f32.mrf.mxu0 }
 0x111   :  { %v202_v10 = vadd.f32 %v2183_v9, %v2046_v8 }
 0x112   :  { %v196_v11 = vpop.f32.mrf.mxu0 }
 0x113   :  { %206 = vst [vmem:[#allocation2 + $0x8] sm:$0xff] %v202_v10  ;;  %v197_v12 = vadd.f32 %v2046_v8, %v196_v11 }
 0x115   :  { %205 = vst [vmem:[#allocation2] sm:$0xff] %v197_v12 }
 0x116   :  { %v286_v13 = vpop.f32.mrf.mxu1 }
 0x118   :  { %v2194_v14 = vpop.f32.mrf.mxu1 }
 0x11c   :  { %v215_v15 = vld [vmem:[#allocation2] sm:$0x3]  ;;  %v321_v31 = vld [vmem:[#allocation2 + $0x2] sm:$0x3]  ;;  %v424_v49 = vld [vmem:[#allocation2 + $0x4] sm:$0x3] }
 0x11d   :  { %v290_v16 = vadd.f32 %v286_v13, %v215_v15  ;;  %v527_v8 = vld [vmem:[#allocation2 + $0x6] sm:$0x3] }
 0x11f   :  { %2395 = vtanh.f32 %v290_v16  ;;  %v2050_v18 = vmul.f32 -1.442695, %v290_v16 }
 0x121   :  { %2397 = vpow2.f32 %v2050_v18 }
 0x12c   :  { %v2396_v17 = vpop.eup %2395 }
 0x12d   :  { %300 = vrot.lane.b32.xlu0 %v2396_v17, %s2683_s0 }
 0x12e   :  { %v2398_v19 = vpop.eup %2397 }
 0x12f   :  { %v294_v20 = vadd.f32 1.0, %v2398_v19 }
 0x131   :  { %2399 = vrcp.f32 %v294_v20 }
 0x13e   :  { %v2400_v21 = vpop.eup %2399 }
 0x13f   :  { %v298_v24 = vmul.f32 0.0, %v2400_v21 }
 0x19f   :  { %v301_v22 = vpop.permute.xlu0 %300 }
 0x1a0   :  { %v303_v23 = vmul.f32 %v2400_v21, %v301_v22 }
 0x1a2   :  { %305 = vrot.lane.b32.xlu0 %v303_v23, %s2684_s20 }
 0x214   :  { %v306_v25 = vpop.permute.xlu0 %305 }
 0x215   :  { %v308_v26 = vadd.f32 %v306_v25, %v298_v24 }
 0x217   :  { %2401 = vtanh.f32 %v308_v26 }
 0x224   :  { %v2402_v27 = vpop.eup %2401 }
 0x225   :  { %311 = vrot.lane.b32.xlu1 %v2402_v27, %s2683_s0 }
 0x297   :  { %v312_v28 = vpop.permute.xlu1 %311 }
 0x298   :  { %v314_v29 = vmul.f32 %v2400_v21, %v312_v28 }
 0x29a   :  { %316 = vrot.lane.b32.xlu1 %v314_v29, %s2684_s20 }
 0x30c   :  { %v317_v30 = vpop.permute.xlu1 %316 }
 0x30d   :  { %320 = vst.msk [vmem:[#allocation4] sm:$0x3] %vm319_vm3, %v317_v30  ;;  %2204 = vmatmul.mubr.msk.f32.vlgmr.msra.gmra.mxu0 %vm216_vm4, %v317_v30 }
 0x30e   :  { %2218 = vmatpush3.msra.mxu0 %v2772_v4  ;;  %2225 = vmatprep.mubr.msk.f32.mxu0 %vm2682_vm0, %v2681_v0 }
 0x30f   :  { %2219 = vmatprep.subr.mxu0 %v2681_v0 }
 0x310   :  { %2220 = vmatpush3.msra.mxu0 %v2774_v5 }
 0x311   :  { %2221 = vmatprep.subr.mxu0 %v2681_v0 }
 0x312   :  { %2222 = vmatpush3.msra.mxu0 %v2778_v6 }
 0x313   :  { %2223 = vmatprep.subr.mxu0 %v2681_v0 }
 0x314   :  { %2224 = vmatpush3.msra.mxu0 %v2783_v7 }
 0x315   :  { %2239 = vmatprep.subr.mxu0 %v2681_v0 }
 0x3cd   :  { %v390_v32 = vpop.f32.mrf.mxu0 }
 0x3ce   :  { %v394_v33 = vadd.f32 %v390_v32, %v321_v31 }
 0x3cf   :  { %v2205_v34 = vpop.f32.mrf.mxu0 }
 0x3d0   :  { %2403 = vtanh.f32 %v394_v33  ;;  %v2052_v36 = vmul.f32 -1.442695, %v394_v33 }
 0x3d2   :  { %2405 = vpow2.f32 %v2052_v36 }
 0x3dd   :  { %v2404_v35 = vpop.eup %2403 }
 0x3de   :  { %404 = vrot.lane.b32.xlu0 %v2404_v35, %s2683_s0 }
 0x3df   :  { %v2406_v37 = vpop.eup %2405 }
 0x3e0   :  { %v398_v38 = vadd.f32 1.0, %v2406_v37 }
 0x3e2   :  { %2407 = vrcp.f32 %v398_v38 }
 0x3ef   :  { %v2408_v39 = vpop.eup %2407 }
 0x3f0   :  { %v402_v42 = vmul.f32 %v2408_v39, %v308_v26  ;;  %v630_v26 = vld [vmem:[#allocation2 + $0x8] sm:$0x3] }
 0x450   :  { %v405_v40 = vpop.permute.xlu0 %404 }
 0x451   :  { %v407_v41 = vmul.f32 %v2408_v39, %v405_v40 }
 0x453   :  { %409 = vrot.lane.b32.xlu1 %v407_v41, %s2684_s20 }
 0x4c5   :  { %v410_v43 = vpop.permute.xlu1 %409 }
 0x4c6   :  { %v412_v44 = vadd.f32 %v410_v43, %v402_v42 }
 0x4c8   :  { %2409 = vtanh.f32 %v412_v44 }
 0x4d5   :  { %v2410_v45 = vpop.eup %2409 }
 0x4d6   :  { %415 = vrot.lane.b32.xlu0 %v2410_v45, %s2683_s0 }
 0x548   :  { %v416_v46 = vpop.permute.xlu0 %415 }
 0x549   :  { %v418_v47 = vmul.f32 %v2408_v39, %v416_v46 }
 0x54b   :  { %420 = vrot.lane.b32.xlu1 %v418_v47, %s2684_s20 }
 0x5bd   :  { %v421_v48 = vpop.permute.xlu1 %420 }
 0x5be   :  { %423 = vst.msk [vmem:[#allocation4 + $0x2] sm:$0x3] %vm319_vm3, %v421_v48  ;;  %2215 = vmatmul.mubr.msk.f32.vlgmr.msra.gmra.mxu1 %vm216_vm4, %v421_v48 }
 0x5bf   :  { %2229 = vmatpush3.msra.mxu1 %v2772_v4  ;;  %2236 = vmatprep.mubr.msk.f32.mxu1 %vm2682_vm0, %v2681_v0 }
 0x5c0   :  { %2230 = vmatprep.subr.mxu1 %v2681_v0 }
 0x5c1   :  { %2231 = vmatpush3.msra.mxu1 %v2774_v5 }
 0x5c2   :  { %2232 = vmatprep.subr.mxu1 %v2681_v0 }
 0x5c3   :  { %2233 = vmatpush3.msra.mxu1 %v2778_v6 }
 0x5c4   :  { %2234 = vmatprep.subr.mxu1 %v2681_v0 }
 0x5c5   :  { %2235 = vmatpush3.msra.mxu1 %v2783_v7 }
 0x5c6   :  { %2250 = vmatprep.subr.mxu1 %v2681_v0 }
 0x67e   :  { %v493_v50 = vpop.f32.mrf.mxu1 }
 0x67f   :  { %v497_v51 = vadd.f32 %v493_v50, %v424_v49 }
 0x680   :  { %v2216_v52 = vpop.f32.mrf.mxu1 }
 0x681   :  { %2411 = vtanh.f32 %v497_v51  ;;  %v2054_v54 = vmul.f32 -1.442695, %v497_v51 }
 0x683   :  { %2413 = vpow2.f32 %v2054_v54 }
 0x68e   :  { %v2412_v53 = vpop.eup %2411 }
 0x68f   :  { %507 = vrot.lane.b32.xlu0 %v2412_v53, %s2683_s0 }
 0x690   :  { %v2414_v55 = vpop.eup %2413 }
 0x691   :  { %v501_v56 = vadd.f32 1.0, %v2414_v55 }
 0x693   :  { %2415 = vrcp.f32 %v501_v56 }
 0x6a0   :  { %v2416_v57 = vpop.eup %2415 }
 0x6a1   :  { %v505_v60 = vmul.f32 %v2416_v57, %v412_v44  ;;  %v733_v44 = vld [vmem:[#allocation2 + $0xa] sm:$0x3] }
 0x701   :  { %v508_v58 = vpop.permute.xlu0 %507 }
 0x702   :  { %v510_v59 = vmul.f32 %v2416_v57, %v508_v58 }
 0x704   :  { %512 = vrot.lane.b32.xlu1 %v510_v59, %s2684_s20  ;;  %v836_v59 = vld [vmem:[#allocation2 + $0xc] sm:$0x3] }
 0x776   :  { %v513_v61 = vpop.permute.xlu1 %512 }
 0x777   :  { %v515_v62 = vadd.f32 %v513_v61, %v505_v60 }
 0x779   :  { %2417 = vtanh.f32 %v515_v62 }
 0x786   :  { %v2418_v63 = vpop.eup %2417 }
 0x787   :  { %518 = vrot.lane.b32.xlu0 %v2418_v63, %s2683_s0 }
 0x7f9   :  { %v519_v1 = vpop.permute.xlu0 %518 }
 0x7fa   :  { %v521_v2 = vmul.f32 %v2416_v57, %v519_v1 }
 0x7fc   :  { %523 = vrot.lane.b32.xlu1 %v521_v2, %s2684_s20 }
 0x86e   :  { %v524_v3 = vpop.permute.xlu1 %523 }
 0x86f   :  { %526 = vst.msk [vmem:[#allocation4 + $0x4] sm:$0x3] %vm319_vm3, %v524_v3  ;;  %2226 = vmatmul.mubr.msk.f32.vlgmr.msra.gmra.mxu0 %vm216_vm4, %v524_v3 }
 0x870   :  { %2240 = vmatpush3.msra.mxu0 %v2772_v4  ;;  %2247 = vmatprep.mubr.msk.f32.mxu0 %vm2682_vm0, %v2681_v0 }
 0x871   :  { %2241 = vmatprep.subr.mxu0 %v2681_v0 }
 0x872   :  { %2242 = vmatpush3.msra.mxu0 %v2774_v5 }
 0x873   :  { %2243 = vmatprep.subr.mxu0 %v2681_v0 }
 0x874   :  { %2244 = vmatpush3.msra.mxu0 %v2778_v6 }
 0x875   :  { %2245 = vmatprep.subr.mxu0 %v2681_v0 }
 0x876   :  { %2246 = vmatpush3.msra.mxu0 %v2783_v7 }
 0x877   :  { %2261 = vmatprep.subr.mxu0 %v2681_v0 }
 0x92f   :  { %v596_v9 = vpop.f32.mrf.mxu0 }
 0x930   :  { %v600_v10 = vadd.f32 %v596_v9, %v527_v8 }
 0x931   :  { %v2227_v11 = vpop.f32.mrf.mxu0 }
 0x932   :  { %2419 = vtanh.f32 %v600_v10  ;;  %v2056_v13 = vmul.f32 -1.442695, %v600_v10 }
 0x934   :  { %2421 = vpow2.f32 %v2056_v13 }
 0x93f   :  { %v2420_v12 = vpop.eup %2419 }
 0x940   :  { %610 = vrot.lane.b32.xlu0 %v2420_v12, %s2683_s0 }
 0x941   :  { %v2422_v14 = vpop.eup %2421 }
 0x942   :  { %v604_v15 = vadd.f32 1.0, %v2422_v14 }
 0x944   :  { %2423 = vrcp.f32 %v604_v15 }
 0x951   :  { %v2424_v16 = vpop.eup %2423 }
 0x952   :  { %v608_v19 = vmul.f32 %v2424_v16, %v515_v62 }
 0x9b2   :  { %v611_v17 = vpop.permute.xlu0 %610 }
 0x9b3   :  { %v613_v18 = vmul.f32 %v2424_v16, %v611_v17 }
 0x9b5   :  { %615 = vrot.lane.b32.xlu1 %v613_v18, %s2684_s20  ;;  %v939_v18 = vld [vmem:[#allocation2 + $0xe] sm:$0x3] }
 0xa27   :  { %v616_v20 = vpop.permute.xlu1 %615 }
 0xa28   :  { %v618_v21 = vadd.f32 %v616_v20, %v608_v19 }
 0xa2a   :  { %2425 = vtanh.f32 %v618_v21 }
 0xa37   :  { %v2426_v22 = vpop.eup %2425 }
 0xa38   :  { %621 = vrot.lane.b32.xlu0 %v2426_v22, %s2683_s0 }
 0xaaa   :  { %v622_v23 = vpop.permute.xlu0 %621 }
 0xaab   :  { %v624_v24 = vmul.f32 %v2424_v16, %v622_v23 }
 0xaad   :  { %626 = vrot.lane.b32.xlu1 %v624_v24, %s2684_s20 }
 0xb1f   :  { %v627_v25 = vpop.permute.xlu1 %626 }
 0xb20   :  { %629 = vst.msk [vmem:[#allocation4 + $0x6] sm:$0x3] %vm319_vm3, %v627_v25  ;;  %2237 = vmatmul.mubr.msk.f32.vlgmr.msra.gmra.mxu1 %vm216_vm4, %v627_v25 }
 0xb21   :  { %2251 = vmatpush3.msra.mxu1 %v2772_v4  ;;  %2258 = vmatprep.mubr.msk.f32.mxu1 %vm2682_vm0, %v2681_v0 }
 0xb22   :  { %2252 = vmatprep.subr.mxu1 %v2681_v0 }
 0xb23   :  { %2253 = vmatpush3.msra.mxu1 %v2774_v5 }
 0xb24   :  { %2254 = vmatprep.subr.mxu1 %v2681_v0 }
 0xb25   :  { %2255 = vmatpush3.msra.mxu1 %v2778_v6 }
 0xb26   :  { %2256 = vmatprep.subr.mxu1 %v2681_v0 }
 0xb27   :  { %2257 = vmatpush3.msra.mxu1 %v2783_v7  ;;  %v1042_v58 = vld [vmem:[#allocation4] sm:$0xff] }
 0xbe0   :  { %v699_v27 = vpop.f32.mrf.mxu1 }
 0xbe1   :  { %v703_v28 = vadd.f32 %v699_v27, %v630_v26 }
 0xbe2   :  { %v2238_v29 = vpop.f32.mrf.mxu1 }
 0xbe3   :  { %2427 = vtanh.f32 %v703_v28  ;;  %v2058_v31 = vmul.f32 -1.442695, %v703_v28 }
 0xbe5   :  { %2429 = vpow2.f32 %v2058_v31 }
 0xbf0   :  { %v2428_v30 = vpop.eup %2427 }
 0xbf1   :  { %713 = vrot.lane.b32.xlu0 %v2428_v30, %s2683_s0 }
 0xbf2   :  { %v2430_v32 = vpop.eup %2429 }
 0xbf3   :  { %v707_v33 = vadd.f32 1.0, %v2430_v32 }
 0xbf5   :  { %2431 = vrcp.f32 %v707_v33  ;;  %v1047_v33 = vld [vmem:[#allocation11 + $0x18] sm:$0xff] }
 0xbf6   :  { %2272 = vmatprep.subr.mxu1 %v1047_v33 }
 0xc02   :  { %v2432_v34 = vpop.eup %2431 }
 0xc03   :  { %v711_v37 = vmul.f32 %v2432_v34, %v618_v21 }
 0xc63   :  { %v714_v35 = vpop.permute.xlu0 %713 }
 0xc64   :  { %v716_v36 = vmul.f32 %v2432_v34, %v714_v35  ;;  %v1045_v35 = vld [vmem:[#allocation11 + $0x8] sm:$0xff] }
 0xc66   :  { %718 = vrot.lane.b32.xlu1 %v716_v36, %s2684_s20  ;;  %v1044_v36 = vld [vmem:[#allocation11] sm:$0xff] }
 0xcd8   :  { %v719_v38 = vpop.permute.xlu1 %718 }
 0xcd9   :  { %v721_v39 = vadd.f32 %v719_v38, %v711_v37  ;;  %v2907_v37 = vld [vmem:[#allocation13 + $0x18] sm:$0xff]  ;;  %v2909_v38 = vld [vmem:[#allocation13 + $0x10] sm:$0xff] }
 0xcdb   :  { %2433 = vtanh.f32 %v721_v39 }
 0xce8   :  { %v2434_v40 = vpop.eup %2433 }
 0xce9   :  { %724 = vrot.lane.b32.xlu0 %v2434_v40, %s2683_s0  ;;  %v2914_v40 = vld [vmem:[#allocation13 + $0x8] sm:$0xff] }
 0xd5b   :  { %v725_v41 = vpop.permute.xlu0 %724 }
 0xd5c   :  { %v727_v42 = vmul.f32 %v2432_v34, %v725_v41  ;;  %v1046_v34 = vld [vmem:[#allocation11 + $0x10] sm:$0xff] }
 0xd5e   :  { %729 = vrot.lane.b32.xlu1 %v727_v42, %s2684_s20  ;;  %v2918_v42 = vld [vmem:[#allocation13] sm:$0xff] }
 0xdd0   :  { %v730_v43 = vpop.permute.xlu1 %729 }
 0xdd1   :  { %732 = vst.msk [vmem:[#allocation4 + $0x8] sm:$0x3] %vm319_vm3, %v730_v43  ;;  %2248 = vmatmul.mubr.msk.f32.vlgmr.msra.gmra.mxu0 %vm216_vm4, %v730_v43 }
 0xdd2   :  { %2262 = vmatpush3.msra.mxu0 %v2772_v4  ;;  %2269 = vmatprep.mubr.msk.f32.mxu0 %vm2682_vm0, %v2681_v0 }
 0xdd3   :  { %2263 = vmatprep.subr.mxu0 %v2681_v0 }
 0xdd4   :  { %2264 = vmatpush3.msra.mxu0 %v2774_v5 }
 0xdd5   :  { %2265 = vmatprep.subr.mxu0 %v2681_v0 }
 0xdd6   :  { %2266 = vmatpush3.msra.mxu0 %v2778_v6 }
 0xdd7   :  { %2267 = vmatprep.subr.mxu0 %v2681_v0 }
 0xdd8   :  { %2268 = vmatpush3.msra.mxu0 %v2783_v7 }
 0xdd9   :  { %2283 = vmatprep.subr.mxu0 %v2681_v0 }
 0xe91   :  { %v802_v45 = vpop.f32.mrf.mxu0 }
 0xe92   :  { %v806_v4 = vadd.f32 %v802_v45, %v733_v44 }
 0xe93   :  { %v2249_v46 = vpop.f32.mrf.mxu0 }
 0xe94   :  { %2435 = vtanh.f32 %v806_v4  ;;  %v2060_v48 = vmul.f32 -1.442695, %v806_v4  ;;  %v2065_v46 = vld [vmem:[#allocation14] ss:$0 sm:$0xff] }
 0xe96   :  { %2437 = vpow2.f32 %v2060_v48 }
 0xea1   :  { %v2436_v47 = vpop.eup %2435 }
 0xea2   :  { %816 = vrot.lane.b32.xlu0 %v2436_v47, %s2683_s0 }
 0xea3   :  { %v2438_v5 = vpop.eup %2437 }
 0xea4   :  { %v810_v49 = vadd.f32 1.0, %v2438_v5 }
 0xea6   :  { %2439 = vrcp.f32 %v810_v49 }
 0xeb3   :  { %v2440_v6 = vpop.eup %2439 }
 0xeb4   :  { %v814_v7 = vmul.f32 %v2440_v6, %v721_v39 }
 0xf14   :  { %v817_v50 = vpop.permute.xlu0 %816 }
 0xf15   :  { %v819_v51 = vmul.f32 %v2440_v6, %v817_v50 }
 0xf17   :  { %821 = vrot.lane.b32.xlu1 %v819_v51, %s2684_s20 }
 0xf89   :  { %v822_v52 = vpop.permute.xlu1 %821 }
 0xf8a   :  { %v824_v53 = vadd.f32 %v822_v52, %v814_v7 }
 0xf8c   :  { %2441 = vtanh.f32 %v824_v53 }
 0xf99   :  { %v2442_v54 = vpop.eup %2441 }
 0xf9a   :  { %827 = vrot.lane.b32.xlu0 %v2442_v54, %s2683_s0 }
0x100c   :  { %v828_v55 = vpop.permute.xlu0 %827 }
0x100d   :  { %v830_v56 = vmul.f32 %v2440_v6, %v828_v55 }
0x100f   :  { %832 = vrot.lane.b32.xlu1 %v830_v56, %s2684_s20 }
0x1081   :  { %v833_v57 = vpop.permute.xlu1 %832 }
0x1082   :  { %835 = vst.msk [vmem:[#allocation4 + $0xa] sm:$0x3] %vm319_vm3, %v833_v57  ;;  %2259 = vmatmul.mubr.msk.f32.vlgmr.msra.gmra.mxu1 %vm216_vm4, %v833_v57 }
0x1083   :  { %2280 = vmatprep.mubr.msk.f32.mxu1 %vm216_vm4, %v1042_v58  ;;  %2273 = vmatpush3.msra.mxu1 %v1047_v33 }
0x1084   :  { %2274 = vmatprep.subr.mxu1 %v1046_v34 }
0x1085   :  { %2275 = vmatpush3.msra.mxu1 %v1046_v34 }
0x1086   :  { %2276 = vmatprep.subr.mxu1 %v1045_v35 }
0x1087   :  { %2277 = vmatpush3.msra.mxu1 %v1045_v35 }
0x1088   :  { %2278 = vmatprep.subr.mxu1 %v1044_v36 }
0x1089   :  { %2279 = vmatpush3.msra.mxu1 %v1044_v36 }
0x108a   :  { %2294 = vmatprep.subr.mxu1 %v2681_v0 }
0x1142   :  { %v905_v60 = vpop.f32.mrf.mxu1 }
0x1143   :  { %v909_v61 = vadd.f32 %v905_v60, %v836_v59 }
0x1144   :  { %v2260_v62 = vpop.f32.mrf.mxu1 }
0x1145   :  { %2443 = vtanh.f32 %v909_v61  ;;  %v2062_v1 = vmul.f32 -1.442695, %v909_v61 }
0x1147   :  { %2445 = vpow2.f32 %v2062_v1 }
0x1152   :  { %v2444_v63 = vpop.eup %2443 }
0x1153   :  { %919 = vrot.lane.b32.xlu0 %v2444_v63, %s2683_s0 }
0x1154   :  { %v2446_v2 = vpop.eup %2445 }
0x1155   :  { %v913_v3 = vadd.f32 1.0, %v2446_v2 }
0x1157   :  { %2447 = vrcp.f32 %v913_v3 }
0x1164   :  { %v2448_v8 = vpop.eup %2447 }
0x1165   :  { %v917_v11 = vmul.f32 %v2448_v8, %v824_v53 }
0x11c5   :  { %v920_v9 = vpop.permute.xlu0 %919 }
0x11c6   :  { %v922_v10 = vmul.f32 %v2448_v8, %v920_v9 }
0x11c8   :  { %924 = vrot.lane.b32.xlu1 %v922_v10, %s2684_s20 }
0x123a   :  { %v925_v12 = vpop.permute.xlu1 %924 }
0x123b   :  { %v927_v13 = vadd.f32 %v925_v12, %v917_v11 }
0x123d   :  { %2449 = vtanh.f32 %v927_v13 }
0x124a   :  { %v2450_v14 = vpop.eup %2449 }
0x124b   :  { %930 = vrot.lane.b32.xlu0 %v2450_v14, %s2683_s0 }
0x12bd   :  { %v931_v15 = vpop.permute.xlu0 %930 }
0x12be   :  { %v933_v16 = vmul.f32 %v2448_v8, %v931_v15 }
0x12c0   :  { %935 = vrot.lane.b32.xlu1 %v933_v16, %s2684_s20 }
0x1332   :  { %v936_v17 = vpop.permute.xlu1 %935 }
0x1333   :  { %938 = vst.msk [vmem:[#allocation4 + $0xc] sm:$0x3] %vm319_vm3, %v936_v17  ;;  %2270 = vmatmul.mubr.msk.f32.vlgmr.msra.gmra.mxu0 %vm216_vm4, %v936_v17 }
0x1334   :  { %2291 = vmatprep.mubr.msk.f32.mxu0 %vm2682_vm0, %v2681_v0  ;;  %2284 = vmatpush3.msra.mxu0 %v2907_v37 }
0x1335   :  { %2285 = vmatprep.subr.mxu0 %v2681_v0 }
0x1336   :  { %2286 = vmatpush3.msra.mxu0 %v2909_v38 }
0x1337   :  { %2287 = vmatprep.subr.mxu0 %v2681_v0 }
0x1338   :  { %2288 = vmatpush3.msra.mxu0 %v2914_v40 }
0x1339   :  { %2289 = vmatprep.subr.mxu0 %v2681_v0 }
0x133a   :  { %2290 = vmatpush3.msra.mxu0 %v2918_v42 }
0x133b   :  { %2292 = vmatmul.mubr.f32.vlgmr.msra.gmra.mxu0 %v2681_v0  ;;  %2305 = vmatprep.subr.mxu0 %v2681_v0 }
0x133c   :  { %2306 = vmatpush3.msra.mxu0 %v2907_v37  ;;  %2313 = vmatprep.mubr.msk.f32.mxu0 %vm2682_vm0, %v2681_v0 }
0x133d   :  { %2307 = vmatprep.subr.mxu0 %v2681_v0 }
0x133e   :  { %2308 = vmatpush3.msra.mxu0 %v2909_v38 }
0x133f   :  { %2309 = vmatprep.subr.mxu0 %v2681_v0 }
0x1340   :  { %2310 = vmatpush3.msra.mxu0 %v2914_v40 }
0x1341   :  { %2311 = vmatprep.subr.mxu0 %v2681_v0 }
0x1342   :  { %2312 = vmatpush3.msra.mxu0 %v2918_v42 }
0x1343   :  { %2327 = vmatprep.subr.mxu0 %v2681_v0 }
0x13f3   :  { %v1008_v19 = vpop.f32.mrf.mxu0 }
0x13f4   :  { %v1012_v20 = vadd.f32 %v1008_v19, %v939_v18 }
0x13f5   :  { %v2271_v21 = vpop.f32.mrf.mxu0 }
0x13f6   :  { %2451 = vtanh.f32 %v1012_v20  ;;  %v2064_v23 = vmul.f32 -1.442695, %v1012_v20 }
0x13f8   :  { %2453 = vpow2.f32 %v2064_v23 }
0x13fb   :  { %v1205_v45 = vpop.f32.mrf.mxu0 }
0x13fd   :  { %v2293_v4 = vpop.f32.mrf.mxu0 }
0x1403   :  { %v2452_v22 = vpop.eup %2451 }
0x1404   :  { %1022 = vrot.lane.b32.xlu0 %v2452_v22, %s2683_s0 }
0x1405   :  { %v2454_v24 = vpop.eup %2453 }
0x1406   :  { %v1016_v25 = vadd.f32 1.0, %v2454_v24 }
0x1408   :  { %2455 = vrcp.f32 %v1016_v25 }
0x1415   :  { %v2456_v26 = vpop.eup %2455 }
0x1416   :  { %v1020_v29 = vmul.f32 %v2456_v26, %v927_v13 }
0x1476   :  { %v1023_v27 = vpop.permute.xlu0 %1022 }
0x1477   :  { %v1025_v28 = vmul.f32 %v2456_v26, %v1023_v27 }
0x1479   :  { %1027 = vrot.lane.b32.xlu1 %v1025_v28, %s2684_s20 }
0x14eb   :  { %v1028_v30 = vpop.permute.xlu1 %1027 }
0x14ec   :  { %v1030_v31 = vadd.f32 %v1028_v30, %v1020_v29 }
0x14ee   :  { %2457 = vtanh.f32 %v1030_v31 }
0x14fb   :  { %v2458_v32 = vpop.eup %2457 }
0x14fc   :  { %1033 = vrot.lane.b32.xlu0 %v2458_v32, %s2683_s0 }
0x156e   :  { %v1034_v39 = vpop.permute.xlu0 %1033 }
0x156f   :  { %v1036_v41 = vmul.f32 %v2456_v26, %v1034_v39 }
0x1571   :  { %1038 = vrot.lane.b32.xlu1 %v1036_v41, %s2684_s20 }
0x15e3   :  { %v1039_v43 = vpop.permute.xlu1 %1038 }
0x15e4   :  { %1041 = vst.msk [vmem:[#allocation4 + $0xe] sm:$0x3] %vm319_vm3, %v1039_v43 }
0x15eb   :  { %v1043_v44 = vld [vmem:[#allocation4 + $0x8] sm:$0xff] }
0x15ec   :  { %2281 = vmatmul.mubr.msk.f32.vlgmr.msra.gmra.mxu1 %vm216_vm4, %v1043_v44 }
0x15ed   :  { %2295 = vmatpush3.msra.mxu1 %v2907_v37  ;;  %2302 = vmatprep.mubr.msk.f32.mxu1 %vm2682_vm0, %v2681_v0 }
0x15ee   :  { %2296 = vmatprep.subr.mxu1 %v2681_v0 }
0x15ef   :  { %2297 = vmatpush3.msra.mxu1 %v2909_v38 }
0x15f0   :  { %2298 = vmatprep.subr.mxu1 %v2681_v0 }
0x15f1   :  { %2299 = vmatpush3.msra.mxu1 %v2914_v40 }
0x15f2   :  { %2300 = vmatprep.subr.mxu1 %v2681_v0 }
0x15f3   :  { %2301 = vmatpush3.msra.mxu1 %v2918_v42 }
0x15f4   :  { %2316 = vmatprep.subr.mxu1 %v2681_v0 }
0x16ac   :  { %v2282_v47 = vpop.f32.mrf.mxu1 }
0x16ad   :  { %v1133_v48 = vadd.f32 %v2282_v47, %v2065_v46 }
0x16ae   :  { %v1127_v5 = vpop.f32.mrf.mxu1 }
0x16af   :  { %1137 = vst [vmem:[#allocation3 + $0x8] sm:$0xff] %v1133_v48  ;;  %v1128_v49 = vadd.f32 %v2065_v46, %v1127_v5 }
0x16b1   :  { %1136 = vst [vmem:[#allocation3] sm:$0xff] %v1128_v49 }
0x16b8   :  { %v1138_v6 = vld [vmem:[#allocation3] sm:$0x3]  ;;  %v1234_v1 = vld [vmem:[#allocation3 + $0x2] sm:$0x3]  ;;  %v1335_v23 = vld [vmem:[#allocation3 + $0x4] sm:$0x3] }
0x16b9   :  { %v1209_v50 = vadd.f32 %v1205_v45, %v1138_v6  ;;  %v1436_v45 = vld [vmem:[#allocation3 + $0x6] sm:$0x3] }
0x16bb   :  { %2459 = vtanh.f32 %v1209_v50  ;;  %v2068_v7 = vmul.f32 -1.442695, %v1209_v50 }
0x16bd   :  { %2461 = vpow2.f32 %v2068_v7 }
0x16c8   :  { %v2460_v51 = vpop.eup %2459 }
0x16c9   :  { %1219 = vrot.lane.b32.xlu0 %v2460_v51, %s2683_s0 }
0x16ca   :  { %v2462_v52 = vpop.eup %2461 }
0x16cb   :  { %v1213_v53 = vadd.f32 1.0, %v2462_v52 }
0x16cd   :  { %2463 = vrcp.f32 %v1213_v53 }
0x16da   :  { %v2464_v54 = vpop.eup %2463 }
0x16db   :  { %v1217_v57 = vmul.f32 0.0, %v2464_v54 }
0x173b   :  { %v1220_v55 = vpop.permute.xlu0 %1219 }
0x173c   :  { %v1222_v56 = vmul.f32 %v2464_v54, %v1220_v55 }
0x173e   :  { %1224 = vrot.lane.b32.xlu1 %v1222_v56, %s2684_s20 }
0x17b0   :  { %v1225_v58 = vpop.permute.xlu1 %1224 }
0x17b1   :  { %v1227_v59 = vadd.f32 %v1225_v58, %v1217_v57 }
0x17b3   :  { %2465 = vtanh.f32 %v1227_v59 }
0x17c0   :  { %v2466_v60 = vpop.eup %2465 }
0x17c1   :  { %1230 = vrot.lane.b32.xlu0 %v2466_v60, %s2683_s0 }
0x1833   :  { %v1231_v61 = vpop.permute.xlu0 %1230 }
0x1834   :  { %v1233_v62 = vmul.f32 %v2464_v54, %v1231_v61 }
0x1836   :  { %1236 = vrot.lane.b32.xlu1 %v1233_v62, %s2684_s20 }
0x18a8   :  { %v1237_v63 = vpop.permute.xlu1 %1236 }
0x18a9   :  { %2303 = vmatmul.mubr.msk.f32.vlgmr.msra.gmra.mxu1 %vm216_vm4, %v1237_v63 }
0x18aa   :  { %2317 = vmatpush3.msra.mxu1 %v2907_v37  ;;  %2324 = vmatprep.mubr.msk.f32.mxu1 %vm2682_vm0, %v2681_v0 }
0x18ab   :  { %2318 = vmatprep.subr.mxu1 %v2681_v0 }
0x18ac   :  { %2319 = vmatpush3.msra.mxu1 %v2909_v38 }
0x18ad   :  { %2320 = vmatprep.subr.mxu1 %v2681_v0 }
0x18ae   :  { %2321 = vmatpush3.msra.mxu1 %v2914_v40 }
0x18af   :  { %2322 = vmatprep.subr.mxu1 %v2681_v0 }
0x18b0   :  { %2323 = vmatpush3.msra.mxu1 %v2918_v42 }
0x18b1   :  { %2338 = vmatprep.subr.mxu1 %v2681_v0 }
0x1969   :  { %v1306_v2 = vpop.f32.mrf.mxu1 }
0x196a   :  { %v1310_v3 = vadd.f32 %v1306_v2, %v1234_v1 }
0x196b   :  { %v2304_v8 = vpop.f32.mrf.mxu1 }
0x196c   :  { %2467 = vtanh.f32 %v1310_v3  ;;  %v2070_v10 = vmul.f32 -1.442695, %v1310_v3 }
0x196e   :  { %2469 = vpow2.f32 %v2070_v10 }
0x1979   :  { %v2468_v9 = vpop.eup %2467 }
0x197a   :  { %1320 = vrot.lane.b32.xlu0 %v2468_v9, %s2683_s0 }
0x197b   :  { %v2470_v11 = vpop.eup %2469 }
0x197c   :  { %v1314_v12 = vadd.f32 1.0, %v2470_v11 }
0x197e   :  { %2471 = vrcp.f32 %v1314_v12 }
0x198b   :  { %v2472_v13 = vpop.eup %2471 }
0x198c   :  { %v1318_v16 = vmul.f32 %v2472_v13, %v1227_v59  ;;  %v1537_v59 = vld [vmem:[#allocation3 + $0x8] sm:$0x3] }
0x19ec   :  { %v1321_v14 = vpop.permute.xlu0 %1320 }
0x19ed   :  { %v1323_v15 = vmul.f32 %v2472_v13, %v1321_v14 }
0x19ef   :  { %1325 = vrot.lane.b32.xlu1 %v1323_v15, %s2684_s20 }
0x1a61   :  { %v1326_v17 = vpop.permute.xlu1 %1325 }
0x1a62   :  { %v1328_v18 = vadd.f32 %v1326_v17, %v1318_v16 }
0x1a64   :  { %2473 = vtanh.f32 %v1328_v18 }
0x1a71   :  { %v2474_v19 = vpop.eup %2473 }
0x1a72   :  { %1331 = vrot.lane.b32.xlu0 %v2474_v19, %s2683_s0 }
0x1ae4   :  { %v1332_v20 = vpop.permute.xlu0 %1331 }
0x1ae5   :  { %v1334_v21 = vmul.f32 %v2472_v13, %v1332_v20 }
0x1ae7   :  { %1337 = vrot.lane.b32.xlu1 %v1334_v21, %s2684_s20 }
0x1b59   :  { %v1338_v22 = vpop.permute.xlu1 %1337 }
0x1b5a   :  { %2314 = vmatmul.mubr.msk.f32.vlgmr.msra.gmra.mxu0 %vm216_vm4, %v1338_v22 }
0x1b5b   :  { %2328 = vmatpush3.msra.mxu0 %v2907_v37  ;;  %2335 = vmatprep.mubr.msk.f32.mxu0 %vm2682_vm0, %v2681_v0 }
0x1b5c   :  { %2329 = vmatprep.subr.mxu0 %v2681_v0 }
0x1b5d   :  { %2330 = vmatpush3.msra.mxu0 %v2909_v38 }
0x1b5e   :  { %2331 = vmatprep.subr.mxu0 %v2681_v0 }
0x1b5f   :  { %2332 = vmatpush3.msra.mxu0 %v2914_v40 }
0x1b60   :  { %2333 = vmatprep.subr.mxu0 %v2681_v0 }
0x1b61   :  { %2334 = vmatpush3.msra.mxu0 %v2918_v42 }
0x1b62   :  { %2349 = vmatprep.subr.mxu0 %v2681_v0 }
0x1c1a   :  { %v1407_v24 = vpop.f32.mrf.mxu0 }
0x1c1b   :  { %v1411_v25 = vadd.f32 %v1407_v24, %v1335_v23 }
0x1c1c   :  { %v2315_v26 = vpop.f32.mrf.mxu0 }
0x1c1d   :  { %2475 = vtanh.f32 %v1411_v25  ;;  %v2072_v28 = vmul.f32 -1.442695, %v1411_v25 }
0x1c1f   :  { %2477 = vpow2.f32 %v2072_v28 }
0x1c2a   :  { %v2476_v27 = vpop.eup %2475 }
0x1c2b   :  { %1421 = vrot.lane.b32.xlu0 %v2476_v27, %s2683_s0 }
0x1c2c   :  { %v2478_v29 = vpop.eup %2477 }
0x1c2d   :  { %v1415_v30 = vadd.f32 1.0, %v2478_v29 }
0x1c2f   :  { %2479 = vrcp.f32 %v1415_v30 }
0x1c3c   :  { %v2480_v31 = vpop.eup %2479 }
0x1c3d   :  { %v1419_v34 = vmul.f32 %v2480_v31, %v1328_v18  ;;  %v1638_v18 = vld [vmem:[#allocation3 + $0xa] sm:$0x3] }
0x1c9d   :  { %v1422_v32 = vpop.permute.xlu0 %1421 }
0x1c9e   :  { %v1424_v33 = vmul.f32 %v2480_v31, %v1422_v32  ;;  %v1739_v32 = vld [vmem:[#allocation3 + $0xc] sm:$0x3] }
0x1ca0   :  { %1426 = vrot.lane.b32.xlu1 %v1424_v33, %s2684_s20 }
0x1d12   :  { %v1427_v35 = vpop.permute.xlu1 %1426 }
0x1d13   :  { %v1429_v36 = vadd.f32 %v1427_v35, %v1419_v34 }
0x1d15   :  { %2481 = vtanh.f32 %v1429_v36 }
0x1d22   :  { %v2482_v39 = vpop.eup %2481 }
0x1d23   :  { %1432 = vrot.lane.b32.xlu0 %v2482_v39, %s2683_s0 }
0x1d95   :  { %v1433_v41 = vpop.permute.xlu0 %1432 }
0x1d96   :  { %v1435_v43 = vmul.f32 %v2480_v31, %v1433_v41 }
0x1d98   :  { %1438 = vrot.lane.b32.xlu1 %v1435_v43, %s2684_s20 }
0x1e0a   :  { %v1439_v44 = vpop.permute.xlu1 %1438 }
0x1e0b   :  { %2325 = vmatmul.mubr.msk.f32.vlgmr.msra.gmra.mxu1 %vm216_vm4, %v1439_v44 }
0x1e0c   :  { %2339 = vmatpush3.msra.mxu1 %v2907_v37  ;;  %2346 = vmatprep.mubr.msk.f32.mxu1 %vm2682_vm0, %v2681_v0 }
0x1e0d   :  { %2340 = vmatprep.subr.mxu1 %v2681_v0 }
0x1e0e   :  { %2341 = vmatpush3.msra.mxu1 %v2909_v38 }
0x1e0f   :  { %2342 = vmatprep.subr.mxu1 %v2681_v0 }
0x1e10   :  { %2343 = vmatpush3.msra.mxu1 %v2914_v40 }
0x1e11   :  { %2344 = vmatprep.subr.mxu1 %v2681_v0 }
0x1e12   :  { %2345 = vmatpush3.msra.mxu1 %v2918_v42 }
0x1e13   :  { %2360 = vmatprep.subr.mxu1 %v2681_v0 }
0x1ecb   :  { %v1508_v4 = vpop.f32.mrf.mxu1 }
0x1ecc   :  { %v1512_v46 = vadd.f32 %v1508_v4, %v1436_v45 }
0x1ecd   :  { %v2326_v47 = vpop.f32.mrf.mxu1 }
0x1ece   :  { %2483 = vtanh.f32 %v1512_v46  ;;  %v2074_v5 = vmul.f32 -1.442695, %v1512_v46 }
0x1ed0   :  { %2485 = vpow2.f32 %v2074_v5 }
0x1edb   :  { %v2484_v48 = vpop.eup %2483 }
0x1edc   :  { %1522 = vrot.lane.b32.xlu0 %v2484_v48, %s2683_s0 }
0x1edd   :  { %v2486_v49 = vpop.eup %2485 }
0x1ede   :  { %v1516_v6 = vadd.f32 1.0, %v2486_v49 }
0x1ee0   :  { %2487 = vrcp.f32 %v1516_v6 }
0x1eed   :  { %v2488_v50 = vpop.eup %2487 }
0x1eee   :  { %v1520_v52 = vmul.f32 %v2488_v50, %v1429_v36 }
0x1f4e   :  { %v1523_v51 = vpop.permute.xlu0 %1522 }
0x1f4f   :  { %v1525_v7 = vmul.f32 %v2488_v50, %v1523_v51  ;;  %v1840_v51 = vld [vmem:[#allocation3 + $0xe] sm:$0x3] }
0x1f51   :  { %1527 = vrot.lane.b32.xlu1 %v1525_v7, %s2684_s20 }
0x1fc3   :  { %v1528_v53 = vpop.permute.xlu1 %1527 }
0x1fc4   :  { %v1530_v54 = vadd.f32 %v1528_v53, %v1520_v52 }
0x1fc6   :  { %2489 = vtanh.f32 %v1530_v54 }
0x1fd3   :  { %v2490_v55 = vpop.eup %2489 }
0x1fd4   :  { %1533 = vrot.lane.b32.xlu0 %v2490_v55, %s2683_s0 }
0x2046   :  { %v1534_v56 = vpop.permute.xlu0 %1533 }
0x2047   :  { %v1536_v57 = vmul.f32 %v2488_v50, %v1534_v56 }
0x2049   :  { %1539 = vrot.lane.b32.xlu1 %v1536_v57, %s2684_s20 }
0x20bb   :  { %v1540_v58 = vpop.permute.xlu1 %1539 }
0x20bc   :  { %2336 = vmatmul.mubr.msk.f32.vlgmr.msra.gmra.mxu0 %vm216_vm4, %v1540_v58 }
0x20bd   :  { %2350 = vmatpush3.msra.mxu0 %v2907_v37  ;;  %2357 = vmatprep.mubr.msk.f32.mxu0 %vm2682_vm0, %v2681_v0 }
0x20be   :  { %2351 = vmatprep.subr.mxu0 %v2681_v0 }
0x20bf   :  { %2352 = vmatpush3.msra.mxu0 %v2909_v38 }
0x20c0   :  { %2353 = vmatprep.subr.mxu0 %v2681_v0 }
0x20c1   :  { %2354 = vmatpush3.msra.mxu0 %v2914_v40 }
0x20c2   :  { %2355 = vmatprep.subr.mxu0 %v2681_v0 }
0x20c3   :  { %2356 = vmatpush3.msra.mxu0 %v2918_v42 }
0x20c4   :  { %2371 = vmatprep.subr.mxu0 %v2681_v0 }
0x217c   :  { %v1609_v60 = vpop.f32.mrf.mxu0 }
0x217d   :  { %v1613_v61 = vadd.f32 %v1609_v60, %v1537_v59 }
0x217e   :  { %v2337_v62 = vpop.f32.mrf.mxu0 }
0x217f   :  { %2491 = vtanh.f32 %v1613_v61  ;;  %v2076_v1 = vmul.f32 -1.442695, %v1613_v61 }
0x2181   :  { %2493 = vpow2.f32 %v2076_v1  ;;  %v1944_v1 = vld [vmem:[%s3067_s7 + $0x18] sm:$0xff] }
0x218c   :  { %v2492_v63 = vpop.eup %2491 }
0x218d   :  { %1623 = vrot.lane.b32.xlu0 %v2492_v63, %s2683_s0 }
0x218e   :  { %v2494_v2 = vpop.eup %2493 }
0x218f   :  { %v1617_v3 = vadd.f32 1.0, %v2494_v2  ;;  %v1943_v2 = vld [vmem:[%s3067_s7 + $0x10] sm:$0xff] }
0x2191   :  { %2495 = vrcp.f32 %v1617_v3  ;;  %v1942_v3 = vld [vmem:[%s3067_s7 + $0x8] sm:$0xff] }
0x219e   :  { %v2496_v8 = vpop.eup %2495 }
0x219f   :  { %v1621_v11 = vmul.f32 %v2496_v8, %v1530_v54 }
0x21ff   :  { %v1624_v9 = vpop.permute.xlu0 %1623 }
0x2200   :  { %v1626_v10 = vmul.f32 %v2496_v8, %v1624_v9 }
0x2202   :  { %1628 = vrot.lane.b32.xlu1 %v1626_v10, %s2684_s20 }
0x2274   :  { %v1629_v12 = vpop.permute.xlu1 %1628 }
0x2275   :  { %v1631_v13 = vadd.f32 %v1629_v12, %v1621_v11 }
0x2277   :  { %2497 = vtanh.f32 %v1631_v13 }
0x2284   :  { %v2498_v14 = vpop.eup %2497 }
0x2285   :  { %1634 = vrot.lane.b32.xlu0 %v2498_v14, %s2683_s0 }
0x22f7   :  { %v1635_v15 = vpop.permute.xlu0 %1634 }
0x22f8   :  { %v1637_v16 = vmul.f32 %v2496_v8, %v1635_v15  ;;  %v1941_v8 = vld [vmem:[%s3067_s7] sm:$0xff]  ;;  %s2034_s7 = sshll.u32 %s2685_s4, 4  ;;  %s2035_s7 = int_to_ptr.vmem [resolvable:$true] %s2034_s7 }
0x22f9   :  { %s2643_s30 = scalar_lea.vmem %s2035_s7, 32  ;;  %p2648_p3 = scmp.lt.s32.totalorder %s2035_s7, %s2035_s7 }
0x22fa   :  { %1640 = vrot.lane.b32.xlu1 %v1637_v16, %s2684_s20  ;;  %p2644_p2 = scmp.ne.s32.totalorder %s2035_s7, %s2643_s30  ;;  %p2649_p4 = scmp.lt.s32.totalorder %s2643_s30, %s2643_s30 }
0x22fc   :  { %p2650_p5 = por %p2649_p4, %p2648_p3 }
0x22fe   :  { %p2651_p6 = pnand %p2650_p5, %p2644_p2 }
0x236c   :  { %v1641_v17 = vpop.permute.xlu1 %1640 }
0x236d   :  { %2347 = vmatmul.mubr.msk.f32.vlgmr.msra.gmra.mxu1 %vm216_vm4, %v1641_v17 }
0x236e   :  { %2361 = vmatpush3.msra.mxu1 %v2907_v37  ;;  %2368 = vmatprep.mubr.msk.f32.mxu1 %vm2682_vm0, %v2681_v0 }
0x236f   :  { %2362 = vmatprep.subr.mxu1 %v2681_v0 }
0x2370   :  { %2363 = vmatpush3.msra.mxu1 %v2909_v38 }
0x2371   :  { %2364 = vmatprep.subr.mxu1 %v2681_v0 }
0x2372   :  { %2365 = vmatpush3.msra.mxu1 %v2914_v40 }
0x2373   :  { %2366 = vmatprep.subr.mxu1 %v2681_v0 }
0x2374   :  { %2367 = vmatpush3.msra.mxu1 %v2918_v42 }
0x242d   :  { %v1710_v19 = vpop.f32.mrf.mxu1 }
0x242e   :  { %v1714_v20 = vadd.f32 %v1710_v19, %v1638_v18 }
0x242f   :  { %v2348_v21 = vpop.f32.mrf.mxu1 }
0x2430   :  { %2499 = vtanh.f32 %v1714_v20  ;;  %v2078_v22 = vmul.f32 -1.442695, %v1714_v20 }
0x2432   :  { %2501 = vpow2.f32 %v2078_v22 }
0x243d   :  { %v2500_v37 = vpop.eup %2499 }
0x243e   :  { %1724 = vrot.lane.b32.xlu0 %v2500_v37, %s2683_s0 }
0x243f   :  { %v2502_v23 = vpop.eup %2501 }
0x2440   :  { %v1718_v38 = vadd.f32 1.0, %v2502_v23 }
0x2442   :  { %2503 = vrcp.f32 %v1718_v38 }
0x244f   :  { %v2504_v24 = vpop.eup %2503 }
0x2450   :  { %v1722_v26 = vmul.f32 %v2504_v24, %v1631_v13  ;;  %v2083_v13 = vld [vmem:[%s3068_s8] ss:$0 sm:$0xff] }
0x24b0   :  { %v1725_v25 = vpop.permute.xlu0 %1724 }
0x24b1   :  { %v1727_v40 = vmul.f32 %v2504_v24, %v1725_v25 }
0x24b3   :  { %1729 = vrot.lane.b32.xlu1 %v1727_v40, %s2684_s20 }
0x2525   :  { %v1730_v42 = vpop.permute.xlu1 %1729 }
0x2526   :  { %v1732_v27 = vadd.f32 %v1730_v42, %v1722_v26 }
0x2528   :  { %2505 = vtanh.f32 %v1732_v27 }
0x2535   :  { %v2506_v28 = vpop.eup %2505 }
0x2536   :  { %1735 = vrot.lane.b32.xlu0 %v2506_v28, %s2683_s0 }
0x25a8   :  { %v1736_v29 = vpop.permute.xlu0 %1735 }
0x25a9   :  { %v1738_v30 = vmul.f32 %v2504_v24, %v1736_v29 }
0x25ab   :  { %1741 = vrot.lane.b32.xlu1 %v1738_v30, %s2684_s20 }
0x261d   :  { %v1742_v31 = vpop.permute.xlu1 %1741 }
0x261e   :  { %2358 = vmatmul.mubr.msk.f32.vlgmr.msra.gmra.mxu0 %vm216_vm4, %v1742_v31 }
0x261f   :  { %2379 = vmatprep.mubr.msk.f32.mxu0 %vm2682_vm0, %v2681_v0  ;;  %2372 = vmatpush3.msra.mxu0 %v1944_v1 }
0x2620   :  { %2373 = vmatprep.subr.mxu0 %v2681_v0 }
0x2621   :  { %2374 = vmatpush3.msra.mxu0 %v1943_v2 }
0x2622   :  { %2375 = vmatprep.subr.mxu0 %v2681_v0 }
0x2623   :  { %2376 = vmatpush3.msra.mxu0 %v1942_v3 }
0x2624   :  { %2377 = vmatprep.subr.mxu0 %v2681_v0 }
0x2625   :  { %2378 = vmatpush3.msra.mxu0 %v1941_v8 }
0x26de   :  { %v1811_v33 = vpop.f32.mrf.mxu0 }
0x26df   :  { %v1815_v34 = vadd.f32 %v1811_v33, %v1739_v32 }
0x26e0   :  { %v2359_v35 = vpop.f32.mrf.mxu0 }
0x26e1   :  { %2507 = vtanh.f32 %v1815_v34  ;;  %v2080_v39 = vmul.f32 -1.442695, %v1815_v34 }
0x26e3   :  { %2509 = vpow2.f32 %v2080_v39 }
0x26ee   :  { %v2508_v36 = vpop.eup %2507 }
0x26ef   :  { %1825 = vrot.lane.b32.xlu0 %v2508_v36, %s2683_s0 }
0x26f0   :  { %v2510_v41 = vpop.eup %2509 }
0x26f1   :  { %v1819_v43 = vadd.f32 1.0, %v2510_v41 }
0x26f3   :  { %2511 = vrcp.f32 %v1819_v43 }
0x2700   :  { %v2512_v44 = vpop.eup %2511 }
0x2701   :  { %v1823_v46 = vmul.f32 %v2512_v44, %v1732_v27 }
0x2761   :  { %v1826_v45 = vpop.permute.xlu0 %1825 }
0x2762   :  { %v1828_v4 = vmul.f32 %v2512_v44, %v1826_v45 }
0x2764   :  { %1830 = vrot.lane.b32.xlu1 %v1828_v4, %s2684_s20 }
0x27d6   :  { %v1831_v47 = vpop.permute.xlu1 %1830 }
0x27d7   :  { %v1833_v48 = vadd.f32 %v1831_v47, %v1823_v46 }
0x27d9   :  { %2513 = vtanh.f32 %v1833_v48 }
0x27e6   :  { %v2514_v5 = vpop.eup %2513 }
0x27e7   :  { %1836 = vrot.lane.b32.xlu0 %v2514_v5, %s2683_s0 }
0x2859   :  { %v1837_v49 = vpop.permute.xlu0 %1836 }
0x285a   :  { %v1839_v6 = vmul.f32 %v2512_v44, %v1837_v49 }
0x285c   :  { %1842 = vrot.lane.b32.xlu1 %v1839_v6, %s2684_s20 }
0x28ce   :  { %v1843_v50 = vpop.permute.xlu1 %1842 }
0x28cf   :  { %2369 = vmatmul.mubr.msk.f32.vlgmr.msra.gmra.mxu1 %vm216_vm4, %v1843_v50 }
0x298f   :  { %v1912_v7 = vpop.f32.mrf.mxu1 }
0x2990   :  { %v1916_v52 = vadd.f32 %v1912_v7, %v1840_v51 }
0x2991   :  { %v2370_v53 = vpop.f32.mrf.mxu1 }
0x2992   :  { %2515 = vtanh.f32 %v1916_v52  ;;  %v2082_v55 = vmul.f32 -1.442695, %v1916_v52 }
0x2994   :  { %2517 = vpow2.f32 %v2082_v55 }
0x299f   :  { %v2516_v54 = vpop.eup %2515 }
0x29a0   :  { %1926 = vrot.lane.b32.xlu0 %v2516_v54, %s2683_s0 }
0x29a1   :  { %v2518_v56 = vpop.eup %2517 }
0x29a2   :  { %v1920_v57 = vadd.f32 1.0, %v2518_v56 }
0x29a4   :  { %2519 = vrcp.f32 %v1920_v57 }
0x29b1   :  { %v2520_v58 = vpop.eup %2519 }
0x29b2   :  { %v1924_v61 = vmul.f32 %v2520_v58, %v1833_v48 }
0x2a12   :  { %v1927_v59 = vpop.permute.xlu0 %1926 }
0x2a13   :  { %v1929_v60 = vmul.f32 %v2520_v58, %v1927_v59 }
0x2a15   :  { %1931 = vrot.lane.b32.xlu1 %v1929_v60, %s2684_s20 }
0x2a87   :  { %v1932_v62 = vpop.permute.xlu1 %1931 }
0x2a88   :  { %v1934_v63 = vadd.f32 %v1932_v62, %v1924_v61 }
0x2a8a   :  { %2521 = vtanh.f32 %v1934_v63 }
0x2a97   :  { %v2522_v9 = vpop.eup %2521 }
0x2a98   :  { %1937 = vrot.lane.b32.xlu0 %v2522_v9, %s2683_s0 }
0x2b0a   :  { %v1938_v10 = vpop.permute.xlu0 %1937 }
0x2b0b   :  { %v1940_v11 = vmul.f32 %v2520_v58, %v1938_v10 }
0x2b0d   :  { %1953 = vrot.lane.b32.xlu1 %v1940_v11, %s2684_s20 }
0x2b7f   :  { %v1954_v12 = vpop.permute.xlu1 %1953 }
0x2b80   :  { %2380 = vmatmul.mubr.msk.f32.vlgmr.msra.gmra.mxu0 %vm216_vm4, %v1954_v12 }
0x2c40   :  { %v2023_v14 = vpop.f32.mrf.mxu0 }
0x2c41   :  { %v2024_v15 = vadd.f32 %v2083_v13, %v2023_v14 }
0x2c42   :  { %v2381_v0 = vpop.f32.mrf.mxu0 }
0x2c43   :  { %2027 = vst [vmem:[#allocation16] sm:$0x3] %v2024_v15 }
0x2c44   :  { %2654 = shalt.err (!%p2651_p6)
}
0x2c45   :  { %2037 = dma.vmem_to_hbm [thread:$0]  %s2035_s7, 32, %s3069_s9, [#allocation7]  }
0x2c46   :  { %2671 = dma.done.wait [#allocation7], 32  }
0x2c47   :  { %2672 = vsyncadd [#allocation7], 4294967264 }
0x2c48   :  { %2041 = vsyncpa [#allocation6], 1 }
0x2c49   :  { %2042 = vsyncpa [#allocation9], 1 }
0x2c4a   :  { %2043 = vsyncpa [#allocation12], 1 }
0x2c4b   :  { %2044 = vsyncpa [#allocation15], 1 }
0x2c4c   :  { %2045 = vsyncpa [#allocation7], 1 }

</bundles_post_ra>
